<compile_context>
chip_gen: v7x
topology: tpu7x:2x2x1
jax: 0.10.0
libtpu: 0.0.40
codegen_flags: <defaults>
</compile_context>

<pallas_src>
import jax
import jax.numpy as jnp
from jax import lax
from jax.experimental import pallas as pl
from jax.experimental.pallas import tpu as pltpu

INPUT_SIZE = 4
HIDDEN = 32
NUM_LAYERS = 2
ACTION_SIZE = 2


def _actor_critic_gru_kernel(
    x_ref,       # (T*B, I)   time-major, flattened over (T, B)
    h0_ref,      # (2, B, H)
    wih0_ref,    # (I, 3H)
    bih0_ref,    # (1, 3H)
    whh0_ref,    # (H, 3H)
    bhh0_ref,    # (1, 3H)
    w1f_ref,     # (2H, 6H)   block-diag fused [[Wih1, 0], [0, Whh1]]
    b1f_ref,     # (1, 6H)    [bih1 | bhh1]
    whead_ref,   # (H, A+1)   [Wpol | Wval]
    bhead_ref,   # (1, A+1)
    head_ref,    # out: (B, A+1)   logits | value
    hnew_ref,    # out: (2, B, H)
    gi0_ref,     # scratch: (T*B, 3H)  hoisted layer-0 input projection
):
    H = HIDDEN
    B = h0_ref.shape[1]
    T = x_ref.shape[0] // B

    # Small weights -> load once into vregs.
    whh0 = whh0_ref[...]
    bhh0 = bhh0_ref[...]
    w1f = w1f_ref[...]
    b1f = b1f_ref[...]

    # Hoisted layer-0 input projection: one (T*B, I) x (I, 3H) matmul instead
    # of T tiny matmuls on the serial recurrent chain.
    gi0_ref[...] = (
        jnp.dot(x_ref[...], wih0_ref[...], preferred_element_type=jnp.float32)
        + bih0_ref[...]
    )

    def gru_update(gi, gh, h_prev):
        # PyTorch GRU gate order (r, z, n); b_hh_n stays inside gh (under r*).
        r = jax.nn.sigmoid(gi[:, 0:H] + gh[:, 0:H])
        z = jax.nn.sigmoid(gi[:, H:2 * H] + gh[:, H:2 * H])
        n = jnp.tanh(gi[:, 2 * H:3 * H] + r * gh[:, 2 * H:3 * H])
        return (1.0 - z) * n + z * h_prev

    def body(t, carry):
        h1, h2 = carry
        # Layer 0: input projection comes from the hoisted scratch; only the
        # hidden-state matmul remains on the serial chain.
        gi0 = gi0_ref[pl.ds(t * B, B), :]
        gh0 = jnp.dot(h1, whh0, preferred_element_type=jnp.float32) + bhh0
        h1 = gru_update(gi0, gh0, h1)
        # Layer 1: both cell matmuls fused into one via the block-diagonal
        # weight -> columns 0:3H are gi1, columns 3H:6H are gh1.
        xh = jnp.concatenate([h1, h2], axis=1)                       # (B, 2H)
        g1 = jnp.dot(xh, w1f, preferred_element_type=jnp.float32) + b1f
        h2 = gru_update(g1[:, 0:3 * H], g1[:, 3 * H:6 * H], h2)
        return (h1, h2)

    # Short static trip count -> fully unroll for LLO scheduler visibility.
    h1, h2 = lax.fori_loop(0, T, body, (h0_ref[0], h0_ref[1]), unroll=True)

    hnew_ref[0] = h1
    hnew_ref[1] = h2
    # Fused policy/value heads: single (B, H) x (H, A+1) matmul epilogue.
    head_ref[...] = (
        jnp.dot(h2, whead_ref[...], preferred_element_type=jnp.float32)
        + bhead_ref[...]
    )


def pack_params(p):
    """One-time repack of raw params into kernel-ready fused weights."""
    H = HIDDEN
    w1f = jnp.zeros((2 * H, 6 * H), jnp.float32)
    w1f = w1f.at[:H, : 3 * H].set(p["wih1_T"])
    w1f = w1f.at[H:, 3 * H:].set(p["whh1_T"])
    return dict(
        wih0=p["wih0_T"], bih0=p["bih0"], whh0=p["whh0_T"], bhh0=p["bhh0"],
        w1f=w1f,
        b1f=jnp.concatenate([p["bih1"], p["bhh1"]], axis=1),
        whead=jnp.concatenate([p["wpol_T"], p["wval_T"]], axis=1),
        bhead=jnp.concatenate([p["bpol"], p["bval"]], axis=1),
    )


def actor_critic_gru_forward(x, h, packed):
    """x: (B, T, INPUT_SIZE) f32, h: (NUM_LAYERS, B, HIDDEN) f32."""
    B, T, I = x.shape
    assert I == INPUT_SIZE and h.shape == (NUM_LAYERS, B, HIDDEN)
    A = ACTION_SIZE
    # Time-major + flattened so the kernel can hoist the layer-0 projection.
    x_k = jnp.transpose(x, (1, 0, 2)).reshape(T * B, I)

    vmem = pl.BlockSpec(memory_space=pltpu.MemorySpace.VMEM)
    inputs = (
        x_k, h,
        packed["wih0"], packed["bih0"], packed["whh0"], packed["bhh0"],
        packed["w1f"], packed["b1f"], packed["whead"], packed["bhead"],
    )
    out_shapes = (
        jax.ShapeDtypeStruct((B, A + 1), jnp.float32),
        jax.ShapeDtypeStruct((NUM_LAYERS, B, HIDDEN), jnp.float32),
    )
    # TODO(synk): for production-scale T*B, stream x via a grid over T
    # (BlockSpec + "arbitrary" axis, h carried in VMEM scratch) and, on v7x,
    # add a "parallel" grid over batch to use the second TensorCore; at these
    # test shapes whole-array VMEM residency is well under every VMEM limit.
    head, h_new = pl.pallas_call(
        _actor_critic_gru_kernel,
        out_shape=out_shapes,
        in_specs=[vmem] * len(inputs),
        out_specs=(vmem, vmem),
        scratch_shapes=[pltpu.VMEM((T * B, 3 * HIDDEN), jnp.float32)],
    )(*inputs)
    logits = head[:, :A]
    value = head[:, A]
    return logits, value, h_new


def init_params(key):
    """Deterministic init mimicking PyTorch's uniform(-1/sqrt(H), 1/sqrt(H))."""
    kb = 1.0 / float(jnp.sqrt(jnp.float32(HIDDEN)))
    keys = jax.random.split(key, 12)

    def u(k_, shape, bound):
        return jax.random.uniform(k_, shape, jnp.float32, -bound, bound)

    p = {}
    # GRU layer 0 (input_size -> hidden)
    p["wih0_T"] = u(keys[0], (INPUT_SIZE, 3 * HIDDEN), kb)
    p["whh0_T"] = u(keys[1], (HIDDEN, 3 * HIDDEN), kb)
    p["bih0"] = u(keys[2], (1, 3 * HIDDEN), kb)
    p["bhh0"] = u(keys[3], (1, 3 * HIDDEN), kb)
    # GRU layer 1 (hidden -> hidden)
    p["wih1_T"] = u(keys[4], (HIDDEN, 3 * HIDDEN), kb)
    p["whh1_T"] = u(keys[5], (HIDDEN, 3 * HIDDEN), kb)
    p["bih1"] = u(keys[6], (1, 3 * HIDDEN), kb)
    p["bhh1"] = u(keys[7], (1, 3 * HIDDEN), kb)
    # heads
    p["wpol_T"] = u(keys[8], (HIDDEN, ACTION_SIZE), kb)
    p["bpol"] = u(keys[9], (1, ACTION_SIZE), kb)
    p["wval_T"] = u(keys[10], (HIDDEN, 1), kb)
    p["bval"] = u(keys[11], (1, 1), kb)
    return p


def reference_forward(x, h, p):
    """Pure-JAX reference of the same PyTorch forward (for a sanity check)."""
    B, T, _ = x.shape
    h1, h2 = h[0], h[1]

    def cell(x_t, hp, wih, whh, bih, bhh):
        gi = x_t @ wih + bih
        gh = hp @ whh + bhh
        r = jax.nn.sigmoid(gi[:, :HIDDEN] + gh[:, :HIDDEN])
        z = jax.nn.sigmoid(gi[:, HIDDEN:2 * HIDDEN] + gh[:, HIDDEN:2 * HIDDEN])
        n = jnp.tanh(gi[:, 2 * HIDDEN:] + r * gh[:, 2 * HIDDEN:])
        return (1.0 - z) * n + z * hp

    for t in range(T):
        x_t = x[:, t, :]
        h1 = cell(x_t, h1, p["wih0_T"], p["whh0_T"], p["bih0"], p["bhh0"])
        h2 = cell(h1, h2, p["wih1_T"], p["whh1_T"], p["bih1"], p["bhh1"])
    logits = h2 @ p["wpol_T"] + p["bpol"]
    value = (h2 @ p["wval_T"] + p["bval"])[:, 0]
    return logits, value, jnp.stack([h1, h2])


if __name__ == "__main__":
    key = jax.random.PRNGKey(0)
    k_param, k_x, k_h = jax.random.split(key, 3)

    B, T = 2, 8
    params = init_params(k_param)
    packed = pack_params(params)
    x = jax.random.normal(k_x, (B, T, INPUT_SIZE), jnp.float32)
    h0 = jnp.zeros((NUM_LAYERS, B, HIDDEN), jnp.float32)

    logits, value, h_new = actor_critic_gru_forward(x, h0, packed)
    jax.block_until_ready((logits, value, h_new))

    ref_logits, ref_value, ref_hnew = reference_forward(x, h0, params)
    assert logits.shape == (B, ACTION_SIZE)
    assert value.shape == (B,)
    assert h_new.shape == (NUM_LAYERS, B, HIDDEN)
    assert jnp.allclose(logits, ref_logits, atol=1e-5)
    assert jnp.allclose(value, ref_value, atol=1e-5)
    assert jnp.allclose(h_new, ref_hnew, atol=1e-5)

    print("KERNEL_OK")
</pallas_src>

<mosaic_0001>
module attributes {stable_mosaic.version = 11 : i64} {
  func.func @_actor_critic_gru_kernel(%arg0: memref<16x4xf32, #tpu.memory_space<vmem>>, %arg1: memref<2x2x32xf32, #tpu.memory_space<vmem>>, %arg2: memref<4x96xf32, #tpu.memory_space<vmem>>, %arg3: memref<1x96xf32, #tpu.memory_space<vmem>>, %arg4: memref<32x96xf32, #tpu.memory_space<vmem>>, %arg5: memref<1x96xf32, #tpu.memory_space<vmem>>, %arg6: memref<64x192xf32, #tpu.memory_space<vmem>>, %arg7: memref<1x192xf32, #tpu.memory_space<vmem>>, %arg8: memref<32x3xf32, #tpu.memory_space<vmem>>, %arg9: memref<1x3xf32, #tpu.memory_space<vmem>>, %arg10: memref<2x3xf32, #tpu.memory_space<vmem>>, %arg11: memref<2x2x32xf32, #tpu.memory_space<vmem>>, %arg12: memref<16x96xf32, #tpu.memory_space<vmem>>) attributes {dimension_semantics = [], scalar_prefetch = 0 : i64, scratch_operands = 1 : i64, tpu.core_type = #tpu.core_type<tc>} {
    %c0 = arith.constant 0 : index
    %c0_0 = arith.constant 0 : index
    %0 = vector.load %arg4[%c0, %c0_0] : memref<32x96xf32, #tpu.memory_space<vmem>>, vector<32x96xf32>
    %c0_1 = arith.constant 0 : index
    %c0_2 = arith.constant 0 : index
    %1 = vector.load %arg5[%c0_1, %c0_2] : memref<1x96xf32, #tpu.memory_space<vmem>>, vector<1x96xf32>
    %c0_3 = arith.constant 0 : index
    %c0_4 = arith.constant 0 : index
    %2 = vector.load %arg6[%c0_3, %c0_4] : memref<64x192xf32, #tpu.memory_space<vmem>>, vector<64x192xf32>
    %c0_5 = arith.constant 0 : index
    %c0_6 = arith.constant 0 : index
    %3 = vector.load %arg7[%c0_5, %c0_6] : memref<1x192xf32, #tpu.memory_space<vmem>>, vector<1x192xf32>
    %c0_7 = arith.constant 0 : index
    %c0_8 = arith.constant 0 : index
    %4 = vector.load %arg0[%c0_7, %c0_8] : memref<16x4xf32, #tpu.memory_space<vmem>>, vector<16x4xf32>
    %c0_9 = arith.constant 0 : index
    %c0_10 = arith.constant 0 : index
    %5 = vector.load %arg2[%c0_9, %c0_10] : memref<4x96xf32, #tpu.memory_space<vmem>>, vector<4x96xf32>
    %cst = arith.constant dense<0.000000e+00> : vector<16x96xf32>
    %6 = tpu.matmul %4, %5, %cst {dimension_numbers = #tpu.dot_dimension_numbers<[1], [0], [0], [1], [0, 0, 1, 1], [], []>} : vector<16x4xf32>, vector<4x96xf32>, vector<16x96xf32> -> vector<16x96xf32>
    %c0_11 = arith.constant 0 : index
    %c0_12 = arith.constant 0 : index
    %7 = vector.load %arg3[%c0_11, %c0_12] : memref<1x96xf32, #tpu.memory_space<vmem>>, vector<1x96xf32>
    %8 = vector.broadcast %7 : vector<1x96xf32> to vector<16x96xf32>
    %9 = arith.addf %6, %8 : vector<16x96xf32>
    %c0_13 = arith.constant 0 : index
    %c0_14 = arith.constant 0 : index
    %10 = vector.load %arg12[%c0_13, %c0_14] : memref<16x96xf32, #tpu.memory_space<vmem>>, vector<16x96xf32>
    tpu.vector_store %arg12[%c0_13, %c0_14], %9 {strides = array<i32>} : memref<16x96xf32, #tpu.memory_space<vmem>>, vector<16x96xf32>,
    %c0_15 = arith.constant 0 : index
    %c0_16 = arith.constant 0 : index
    %c0_17 = arith.constant 0 : index
    %11 = vector.load %arg1[%c0_15, %c0_16, %c0_17] : memref<2x2x32xf32, #tpu.memory_space<vmem>>, vector<1x2x32xf32>
    %12 = vector.shape_cast %11 : vector<1x2x32xf32> to vector<2x32xf32>
    %c1 = arith.constant 1 : index
    %c0_18 = arith.constant 0 : index
    %c0_19 = arith.constant 0 : index
    %13 = vector.load %arg1[%c1, %c0_18, %c0_19] : memref<2x2x32xf32, #tpu.memory_space<vmem>>, vector<1x2x32xf32>
    %14 = vector.shape_cast %13 : vector<1x2x32xf32> to vector<2x32xf32>
    %c0_i32 = arith.constant 0 : i32
    %c2_i32 = arith.constant 2 : i32
    %15 = arith.muli %c0_i32, %c2_i32 : i32
    %16 = arith.index_cast %15 : i32 to index
    %c0_20 = arith.constant 0 : index
    %17 = vector.load %arg12[%16, %c0_20] : memref<16x96xf32, #tpu.memory_space<vmem>>, vector<2x96xf32>
    %cst_21 = arith.constant dense<0.000000e+00> : vector<2x96xf32>
    %18 = tpu.matmul %12, %0, %cst_21 {dimension_numbers = #tpu.dot_dimension_numbers<[1], [0], [0], [1], [0, 0, 1, 1], [], []>} : vector<2x32xf32>, vector<32x96xf32>, vector<2x96xf32> -> vector<2x96xf32>
    %19 = vector.broadcast %1 : vector<1x96xf32> to vector<2x96xf32>
    %20 = arith.addf %18, %19 : vector<2x96xf32>
    %21 = vector.extract_strided_slice %17 {offsets = [0, 0], sizes = [2, 32], strides = [1, 1]} : vector<2x96xf32> to vector<2x32xf32>
    %22 = vector.extract_strided_slice %20 {offsets = [0, 0], sizes = [2, 32], strides = [1, 1]} : vector<2x96xf32> to vector<2x32xf32>
    %23 = arith.addf %21, %22 : vector<2x32xf32>
    %24 = arith.negf %23 : vector<2x32xf32>
    %25 = math.exp %24 : vector<2x32xf32>
    %cst_22 = arith.constant 1.000000e+00 : f32
    %26 = vector.broadcast %cst_22 : f32 to vector<2x32xf32>
    %27 = arith.addf %26, %25 : vector<2x32xf32>
    %28 = arith.divf %26, %27 : vector<2x32xf32>
    %29 = vector.extract_strided_slice %17 {offsets = [0, 32], sizes = [2, 32], strides = [1, 1]} : vector<2x96xf32> to vector<2x32xf32>
    %30 = vector.extract_strided_slice %20 {offsets = [0, 32], sizes = [2, 32], strides = [1, 1]} : vector<2x96xf32> to vector<2x32xf32>
    %31 = arith.addf %29, %30 : vector<2x32xf32>
    %32 = arith.negf %31 : vector<2x32xf32>
    %33 = math.exp %32 : vector<2x32xf32>
    %cst_23 = arith.constant 1.000000e+00 : f32
    %34 = vector.broadcast %cst_23 : f32 to vector<2x32xf32>
    %35 = arith.addf %34, %33 : vector<2x32xf32>
    %36 = arith.divf %34, %35 : vector<2x32xf32>
    %37 = vector.extract_strided_slice %17 {offsets = [0, 64], sizes = [2, 32], strides = [1, 1]} : vector<2x96xf32> to vector<2x32xf32>
    %38 = vector.extract_strided_slice %20 {offsets = [0, 64], sizes = [2, 32], strides = [1, 1]} : vector<2x96xf32> to vector<2x32xf32>
    %39 = arith.mulf %28, %38 : vector<2x32xf32>
    %40 = arith.addf %37, %39 : vector<2x32xf32>
    %41 = math.tanh %40 : vector<2x32xf32>
    %cst_24 = arith.constant 1.000000e+00 : f32
    %42 = vector.broadcast %cst_24 : f32 to vector<2x32xf32>
    %43 = arith.subf %42, %36 : vector<2x32xf32>
    %44 = arith.mulf %43, %41 : vector<2x32xf32>
    %45 = arith.mulf %36, %12 : vector<2x32xf32>
    %46 = arith.addf %44, %45 : vector<2x32xf32>
    %47 = tpu.concatenate %46, %14 in 1 : vector<2x32xf32>, vector<2x32xf32> -> vector<2x64xf32>
    %cst_25 = arith.constant dense<0.000000e+00> : vector<2x192xf32>
    %48 = tpu.matmul %47, %2, %cst_25 {dimension_numbers = #tpu.dot_dimension_numbers<[1], [0], [0], [1], [0, 0, 1, 1], [], []>} : vector<2x64xf32>, vector<64x192xf32>, vector<2x192xf32> -> vector<2x192xf32>
    %49 = vector.broadcast %3 : vector<1x192xf32> to vector<2x192xf32>
    %50 = arith.addf %48, %49 : vector<2x192xf32>
    %51 = vector.extract_strided_slice %50 {offsets = [0, 0], sizes = [2, 96], strides = [1, 1]} : vector<2x192xf32> to vector<2x96xf32>
    %52 = vector.extract_strided_slice %50 {offsets = [0, 96], sizes = [2, 96], strides = [1, 1]} : vector<2x192xf32> to vector<2x96xf32>
    %53 = vector.extract_strided_slice %51 {offsets = [0, 0], sizes = [2, 32], strides = [1, 1]} : vector<2x96xf32> to vector<2x32xf32>
    %54 = vector.extract_strided_slice %52 {offsets = [0, 0], sizes = [2, 32], strides = [1, 1]} : vector<2x96xf32> to vector<2x32xf32>
    %55 = arith.addf %53, %54 : vector<2x32xf32>
    %56 = arith.negf %55 : vector<2x32xf32>
    %57 = math.exp %56 : vector<2x32xf32>
    %cst_26 = arith.constant 1.000000e+00 : f32
    %58 = vector.broadcast %cst_26 : f32 to vector<2x32xf32>
    %59 = arith.addf %58, %57 : vector<2x32xf32>
    %60 = arith.divf %58, %59 : vector<2x32xf32>
    %61 = vector.extract_strided_slice %51 {offsets = [0, 32], sizes = [2, 32], strides = [1, 1]} : vector<2x96xf32> to vector<2x32xf32>
    %62 = vector.extract_strided_slice %52 {offsets = [0, 32], sizes = [2, 32], strides = [1, 1]} : vector<2x96xf32> to vector<2x32xf32>
    %63 = arith.addf %61, %62 : vector<2x32xf32>
    %64 = arith.negf %63 : vector<2x32xf32>
    %65 = math.exp %64 : vector<2x32xf32>
    %cst_27 = arith.constant 1.000000e+00 : f32
    %66 = vector.broadcast %cst_27 : f32 to vector<2x32xf32>
    %67 = arith.addf %66, %65 : vector<2x32xf32>
    %68 = arith.divf %66, %67 : vector<2x32xf32>
    %69 = vector.extract_strided_slice %51 {offsets = [0, 64], sizes = [2, 32], strides = [1, 1]} : vector<2x96xf32> to vector<2x32xf32>
    %70 = vector.extract_strided_slice %52 {offsets = [0, 64], sizes = [2, 32], strides = [1, 1]} : vector<2x96xf32> to vector<2x32xf32>
    %71 = arith.mulf %60, %70 : vector<2x32xf32>
    %72 = arith.addf %69, %71 : vector<2x32xf32>
    %73 = math.tanh %72 : vector<2x32xf32>
    %cst_28 = arith.constant 1.000000e+00 : f32
    %74 = vector.broadcast %cst_28 : f32 to vector<2x32xf32>
    %75 = arith.subf %74, %68 : vector<2x32xf32>
    %76 = arith.mulf %75, %73 : vector<2x32xf32>
    %77 = arith.mulf %68, %14 : vector<2x32xf32>
    %78 = arith.addf %76, %77 : vector<2x32xf32>
    %c1_i32 = arith.constant 1 : i32
    %c2_i32_29 = arith.constant 2 : i32
    %79 = arith.muli %c1_i32, %c2_i32_29 : i32
    %80 = arith.index_cast %79 : i32 to index
    %c0_30 = arith.constant 0 : index
    %81 = vector.load %arg12[%80, %c0_30] : memref<16x96xf32, #tpu.memory_space<vmem>>, vector<2x96xf32>
    %cst_31 = arith.constant dense<0.000000e+00> : vector<2x96xf32>
    %82 = tpu.matmul %46, %0, %cst_31 {dimension_numbers = #tpu.dot_dimension_numbers<[1], [0], [0], [1], [0, 0, 1, 1], [], []>} : vector<2x32xf32>, vector<32x96xf32>, vector<2x96xf32> -> vector<2x96xf32>
    %83 = vector.broadcast %1 : vector<1x96xf32> to vector<2x96xf32>
    %84 = arith.addf %82, %83 : vector<2x96xf32>
    %85 = vector.extract_strided_slice %81 {offsets = [0, 0], sizes = [2, 32], strides = [1, 1]} : vector<2x96xf32> to vector<2x32xf32>
    %86 = vector.extract_strided_slice %84 {offsets = [0, 0], sizes = [2, 32], strides = [1, 1]} : vector<2x96xf32> to vector<2x32xf32>
    %87 = arith.addf %85, %86 : vector<2x32xf32>
    %88 = arith.negf %87 : vector<2x32xf32>
    %89 = math.exp %88 : vector<2x32xf32>
    %cst_32 = arith.constant 1.000000e+00 : f32
    %90 = vector.broadcast %cst_32 : f32 to vector<2x32xf32>
    %91 = arith.addf %90, %89 : vector<2x32xf32>
    %92 = arith.divf %90, %91 : vector<2x32xf32>
    %93 = vector.extract_strided_slice %81 {offsets = [0, 32], sizes = [2, 32], strides = [1, 1]} : vector<2x96xf32> to vector<2x32xf32>
    %94 = vector.extract_strided_slice %84 {offsets = [0, 32], sizes = [2, 32], strides = [1, 1]} : vector<2x96xf32> to vector<2x32xf32>
    %95 = arith.addf %93, %94 : vector<2x32xf32>
    %96 = arith.negf %95 : vector<2x32xf32>
    %97 = math.exp %96 : vector<2x32xf32>
    %cst_33 = arith.constant 1.000000e+00 : f32
    %98 = vector.broadcast %cst_33 : f32 to vector<2x32xf32>
    %99 = arith.addf %98, %97 : vector<2x32xf32>
    %100 = arith.divf %98, %99 : vector<2x32xf32>
    %101 = vector.extract_strided_slice %81 {offsets = [0, 64], sizes = [2, 32], strides = [1, 1]} : vector<2x96xf32> to vector<2x32xf32>
    %102 = vector.extract_strided_slice %84 {offsets = [0, 64], sizes = [2, 32], strides = [1, 1]} : vector<2x96xf32> to vector<2x32xf32>
    %103 = arith.mulf %92, %102 : vector<2x32xf32>
    %104 = arith.addf %101, %103 : vector<2x32xf32>
    %105 = math.tanh %104 : vector<2x32xf32>
    %cst_34 = arith.constant 1.000000e+00 : f32
    %106 = vector.broadcast %cst_34 : f32 to vector<2x32xf32>
    %107 = arith.subf %106, %100 : vector<2x32xf32>
    %108 = arith.mulf %107, %105 : vector<2x32xf32>
    %109 = arith.mulf %100, %46 : vector<2x32xf32>
    %110 = arith.addf %108, %109 : vector<2x32xf32>
    %111 = tpu.concatenate %110, %78 in 1 : vector<2x32xf32>, vector<2x32xf32> -> vector<2x64xf32>
    %cst_35 = arith.constant dense<0.000000e+00> : vector<2x192xf32>
    %112 = tpu.matmul %111, %2, %cst_35 {dimension_numbers = #tpu.dot_dimension_numbers<[1], [0], [0], [1], [0, 0, 1, 1], [], []>} : vector<2x64xf32>, vector<64x192xf32>, vector<2x192xf32> -> vector<2x192xf32>
    %113 = vector.broadcast %3 : vector<1x192xf32> to vector<2x192xf32>
    %114 = arith.addf %112, %113 : vector<2x192xf32>
    %115 = vector.extract_strided_slice %114 {offsets = [0, 0], sizes = [2, 96], strides = [1, 1]} : vector<2x192xf32> to vector<2x96xf32>
    %116 = vector.extract_strided_slice %114 {offsets = [0, 96], sizes = [2, 96], strides = [1, 1]} : vector<2x192xf32> to vector<2x96xf32>
    %117 = vector.extract_strided_slice %115 {offsets = [0, 0], sizes = [2, 32], strides = [1, 1]} : vector<2x96xf32> to vector<2x32xf32>
    %118 = vector.extract_strided_slice %116 {offsets = [0, 0], sizes = [2, 32], strides = [1, 1]} : vector<2x96xf32> to vector<2x32xf32>
    %119 = arith.addf %117, %118 : vector<2x32xf32>
    %120 = arith.negf %119 : vector<2x32xf32>
    %121 = math.exp %120 : vector<2x32xf32>
    %cst_36 = arith.constant 1.000000e+00 : f32
    %122 = vector.broadcast %cst_36 : f32 to vector<2x32xf32>
    %123 = arith.addf %122, %121 : vector<2x32xf32>
    %124 = arith.divf %122, %123 : vector<2x32xf32>
    %125 = vector.extract_strided_slice %115 {offsets = [0, 32], sizes = [2, 32], strides = [1, 1]} : vector<2x96xf32> to vector<2x32xf32>
    %126 = vector.extract_strided_slice %116 {offsets = [0, 32], sizes = [2, 32], strides = [1, 1]} : vector<2x96xf32> to vector<2x32xf32>
    %127 = arith.addf %125, %126 : vector<2x32xf32>
    %128 = arith.negf %127 : vector<2x32xf32>
    %129 = math.exp %128 : vector<2x32xf32>
    %cst_37 = arith.constant 1.000000e+00 : f32
    %130 = vector.broadcast %cst_37 : f32 to vector<2x32xf32>
    %131 = arith.addf %130, %129 : vector<2x32xf32>
    %132 = arith.divf %130, %131 : vector<2x32xf32>
    %133 = vector.extract_strided_slice %115 {offsets = [0, 64], sizes = [2, 32], strides = [1, 1]} : vector<2x96xf32> to vector<2x32xf32>
    %134 = vector.extract_strided_slice %116 {offsets = [0, 64], sizes = [2, 32], strides = [1, 1]} : vector<2x96xf32> to vector<2x32xf32>
    %135 = arith.mulf %124, %134 : vector<2x32xf32>
    %136 = arith.addf %133, %135 : vector<2x32xf32>
    %137 = math.tanh %136 : vector<2x32xf32>
    %cst_38 = arith.constant 1.000000e+00 : f32
    %138 = vector.broadcast %cst_38 : f32 to vector<2x32xf32>
    %139 = arith.subf %138, %132 : vector<2x32xf32>
    %140 = arith.mulf %139, %137 : vector<2x32xf32>
    %141 = arith.mulf %132, %78 : vector<2x32xf32>
    %142 = arith.addf %140, %141 : vector<2x32xf32>
    %c2_i32_39 = arith.constant 2 : i32
    %c2_i32_40 = arith.constant 2 : i32
    %143 = arith.muli %c2_i32_39, %c2_i32_40 : i32
    %144 = arith.index_cast %143 : i32 to index
    %c0_41 = arith.constant 0 : index
    %145 = vector.load %arg12[%144, %c0_41] : memref<16x96xf32, #tpu.memory_space<vmem>>, vector<2x96xf32>
    %cst_42 = arith.constant dense<0.000000e+00> : vector<2x96xf32>
    %146 = tpu.matmul %110, %0, %cst_42 {dimension_numbers = #tpu.dot_dimension_numbers<[1], [0], [0], [1], [0, 0, 1, 1], [], []>} : vector<2x32xf32>, vector<32x96xf32>, vector<2x96xf32> -> vector<2x96xf32>
    %147 = vector.broadcast %1 : vector<1x96xf32> to vector<2x96xf32>
    %148 = arith.addf %146, %147 : vector<2x96xf32>
    %149 = vector.extract_strided_slice %145 {offsets = [0, 0], sizes = [2, 32], strides = [1, 1]} : vector<2x96xf32> to vector<2x32xf32>
    %150 = vector.extract_strided_slice %148 {offsets = [0, 0], sizes = [2, 32], strides = [1, 1]} : vector<2x96xf32> to vector<2x32xf32>
    %151 = arith.addf %149, %150 : vector<2x32xf32>
    %152 = arith.negf %151 : vector<2x32xf32>
    %153 = math.exp %152 : vector<2x32xf32>
    %cst_43 = arith.constant 1.000000e+00 : f32
    %154 = vector.broadcast %cst_43 : f32 to vector<2x32xf32>
    %155 = arith.addf %154, %153 : vector<2x32xf32>
    %156 = arith.divf %154, %155 : vector<2x32xf32>
    %157 = vector.extract_strided_slice %145 {offsets = [0, 32], sizes = [2, 32], strides = [1, 1]} : vector<2x96xf32> to vector<2x32xf32>
    %158 = vector.extract_strided_slice %148 {offsets = [0, 32], sizes = [2, 32], strides = [1, 1]} : vector<2x96xf32> to vector<2x32xf32>
    %159 = arith.addf %157, %158 : vector<2x32xf32>
    %160 = arith.negf %159 : vector<2x32xf32>
    %161 = math.exp %160 : vector<2x32xf32>
    %cst_44 = arith.constant 1.000000e+00 : f32
    %162 = vector.broadcast %cst_44 : f32 to vector<2x32xf32>
    %163 = arith.addf %162, %161 : vector<2x32xf32>
    %164 = arith.divf %162, %163 : vector<2x32xf32>
    %165 = vector.extract_strided_slice %145 {offsets = [0, 64], sizes = [2, 32], strides = [1, 1]} : vector<2x96xf32> to vector<2x32xf32>
    %166 = vector.extract_strided_slice %148 {offsets = [0, 64], sizes = [2, 32], strides = [1, 1]} : vector<2x96xf32> to vector<2x32xf32>
    %167 = arith.mulf %156, %166 : vector<2x32xf32>
    %168 = arith.addf %165, %167 : vector<2x32xf32>
    %169 = math.tanh %168 : vector<2x32xf32>
    %cst_45 = arith.constant 1.000000e+00 : f32
    %170 = vector.broadcast %cst_45 : f32 to vector<2x32xf32>
    %171 = arith.subf %170, %164 : vector<2x32xf32>
    %172 = arith.mulf %171, %169 : vector<2x32xf32>
    %173 = arith.mulf %164, %110 : vector<2x32xf32>
    %174 = arith.addf %172, %173 : vector<2x32xf32>
    %175 = tpu.concatenate %174, %142 in 1 : vector<2x32xf32>, vector<2x32xf32> -> vector<2x64xf32>
    %cst_46 = arith.constant dense<0.000000e+00> : vector<2x192xf32>
    %176 = tpu.matmul %175, %2, %cst_46 {dimension_numbers = #tpu.dot_dimension_numbers<[1], [0], [0], [1], [0, 0, 1, 1], [], []>} : vector<2x64xf32>, vector<64x192xf32>, vector<2x192xf32> -> vector<2x192xf32>
    %177 = vector.broadcast %3 : vector<1x192xf32> to vector<2x192xf32>
    %178 = arith.addf %176, %177 : vector<2x192xf32>
    %179 = vector.extract_strided_slice %178 {offsets = [0, 0], sizes = [2, 96], strides = [1, 1]} : vector<2x192xf32> to vector<2x96xf32>
    %180 = vector.extract_strided_slice %178 {offsets = [0, 96], sizes = [2, 96], strides = [1, 1]} : vector<2x192xf32> to vector<2x96xf32>
    %181 = vector.extract_strided_slice %179 {offsets = [0, 0], sizes = [2, 32], strides = [1, 1]} : vector<2x96xf32> to vector<2x32xf32>
    %182 = vector.extract_strided_slice %180 {offsets = [0, 0], sizes = [2, 32], strides = [1, 1]} : vector<2x96xf32> to vector<2x32xf32>
    %183 = arith.addf %181, %182 : vector<2x32xf32>
    %184 = arith.negf %183 : vector<2x32xf32>
    %185 = math.exp %184 : vector<2x32xf32>
    %cst_47 = arith.constant 1.000000e+00 : f32
    %186 = vector.broadcast %cst_47 : f32 to vector<2x32xf32>
    %187 = arith.addf %186, %185 : vector<2x32xf32>
    %188 = arith.divf %186, %187 : vector<2x32xf32>
    %189 = vector.extract_strided_slice %179 {offsets = [0, 32], sizes = [2, 32], strides = [1, 1]} : vector<2x96xf32> to vector<2x32xf32>
    %190 = vector.extract_strided_slice %180 {offsets = [0, 32], sizes = [2, 32], strides = [1, 1]} : vector<2x96xf32> to vector<2x32xf32>
    %191 = arith.addf %189, %190 : vector<2x32xf32>
    %192 = arith.negf %191 : vector<2x32xf32>
    %193 = math.exp %192 : vector<2x32xf32>
    %cst_48 = arith.constant 1.000000e+00 : f32
    %194 = vector.broadcast %cst_48 : f32 to vector<2x32xf32>
    %195 = arith.addf %194, %193 : vector<2x32xf32>
    %196 = arith.divf %194, %195 : vector<2x32xf32>
    %197 = vector.extract_strided_slice %179 {offsets = [0, 64], sizes = [2, 32], strides = [1, 1]} : vector<2x96xf32> to vector<2x32xf32>
    %198 = vector.extract_strided_slice %180 {offsets = [0, 64], sizes = [2, 32], strides = [1, 1]} : vector<2x96xf32> to vector<2x32xf32>
    %199 = arith.mulf %188, %198 : vector<2x32xf32>
    %200 = arith.addf %197, %199 : vector<2x32xf32>
    %201 = math.tanh %200 : vector<2x32xf32>
    %cst_49 = arith.constant 1.000000e+00 : f32
    %202 = vector.broadcast %cst_49 : f32 to vector<2x32xf32>
    %203 = arith.subf %202, %196 : vector<2x32xf32>
    %204 = arith.mulf %203, %201 : vector<2x32xf32>
    %205 = arith.mulf %196, %142 : vector<2x32xf32>
    %206 = arith.addf %204, %205 : vector<2x32xf32>
    %c3_i32 = arith.constant 3 : i32
    %c2_i32_50 = arith.constant 2 : i32
    %207 = arith.muli %c3_i32, %c2_i32_50 : i32
    %208 = arith.index_cast %207 : i32 to index
    %c0_51 = arith.constant 0 : index
    %209 = vector.load %arg12[%208, %c0_51] : memref<16x96xf32, #tpu.memory_space<vmem>>, vector<2x96xf32>
    %cst_52 = arith.constant dense<0.000000e+00> : vector<2x96xf32>
    %210 = tpu.matmul %174, %0, %cst_52 {dimension_numbers = #tpu.dot_dimension_numbers<[1], [0], [0], [1], [0, 0, 1, 1], [], []>} : vector<2x32xf32>, vector<32x96xf32>, vector<2x96xf32> -> vector<2x96xf32>
    %211 = vector.broadcast %1 : vector<1x96xf32> to vector<2x96xf32>
    %212 = arith.addf %210, %211 : vector<2x96xf32>
    %213 = vector.extract_strided_slice %209 {offsets = [0, 0], sizes = [2, 32], strides = [1, 1]} : vector<2x96xf32> to vector<2x32xf32>
    %214 = vector.extract_strided_slice %212 {offsets = [0, 0], sizes = [2, 32], strides = [1, 1]} : vector<2x96xf32> to vector<2x32xf32>
    %215 = arith.addf %213, %214 : vector<2x32xf32>
    %216 = arith.negf %215 : vector<2x32xf32>
    %217 = math.exp %216 : vector<2x32xf32>
    %cst_53 = arith.constant 1.000000e+00 : f32
    %218 = vector.broadcast %cst_53 : f32 to vector<2x32xf32>
    %219 = arith.addf %218, %217 : vector<2x32xf32>
    %220 = arith.divf %218, %219 : vector<2x32xf32>
    %221 = vector.extract_strided_slice %209 {offsets = [0, 32], sizes = [2, 32], strides = [1, 1]} : vector<2x96xf32> to vector<2x32xf32>
    %222 = vector.extract_strided_slice %212 {offsets = [0, 32], sizes = [2, 32], strides = [1, 1]} : vector<2x96xf32> to vector<2x32xf32>
    %223 = arith.addf %221, %222 : vector<2x32xf32>
    %224 = arith.negf %223 : vector<2x32xf32>
    %225 = math.exp %224 : vector<2x32xf32>
    %cst_54 = arith.constant 1.000000e+00 : f32
    %226 = vector.broadcast %cst_54 : f32 to vector<2x32xf32>
    %227 = arith.addf %226, %225 : vector<2x32xf32>
    %228 = arith.divf %226, %227 : vector<2x32xf32>
    %229 = vector.extract_strided_slice %209 {offsets = [0, 64], sizes = [2, 32], strides = [1, 1]} : vector<2x96xf32> to vector<2x32xf32>
    %230 = vector.extract_strided_slice %212 {offsets = [0, 64], sizes = [2, 32], strides = [1, 1]} : vector<2x96xf32> to vector<2x32xf32>
    %231 = arith.mulf %220, %230 : vector<2x32xf32>
    %232 = arith.addf %229, %231 : vector<2x32xf32>
    %233 = math.tanh %232 : vector<2x32xf32>
    %cst_55 = arith.constant 1.000000e+00 : f32
    %234 = vector.broadcast %cst_55 : f32 to vector<2x32xf32>
    %235 = arith.subf %234, %228 : vector<2x32xf32>
    %236 = arith.mulf %235, %233 : vector<2x32xf32>
    %237 = arith.mulf %228, %174 : vector<2x32xf32>
    %238 = arith.addf %236, %237 : vector<2x32xf32>
    %239 = tpu.concatenate %238, %206 in 1 : vector<2x32xf32>, vector<2x32xf32> -> vector<2x64xf32>
    %cst_56 = arith.constant dense<0.000000e+00> : vector<2x192xf32>
    %240 = tpu.matmul %239, %2, %cst_56 {dimension_numbers = #tpu.dot_dimension_numbers<[1], [0], [0], [1], [0, 0, 1, 1], [], []>} : vector<2x64xf32>, vector<64x192xf32>, vector<2x192xf32> -> vector<2x192xf32>
    %241 = vector.broadcast %3 : vector<1x192xf32> to vector<2x192xf32>
    %242 = arith.addf %240, %241 : vector<2x192xf32>
    %243 = vector.extract_strided_slice %242 {offsets = [0, 0], sizes = [2, 96], strides = [1, 1]} : vector<2x192xf32> to vector<2x96xf32>
    %244 = vector.extract_strided_slice %242 {offsets = [0, 96], sizes = [2, 96], strides = [1, 1]} : vector<2x192xf32> to vector<2x96xf32>
    %245 = vector.extract_strided_slice %243 {offsets = [0, 0], sizes = [2, 32], strides = [1, 1]} : vector<2x96xf32> to vector<2x32xf32>
    %246 = vector.extract_strided_slice %244 {offsets = [0, 0], sizes = [2, 32], strides = [1, 1]} : vector<2x96xf32> to vector<2x32xf32>
    %247 = arith.addf %245, %246 : vector<2x32xf32>
    %248 = arith.negf %247 : vector<2x32xf32>
    %249 = math.exp %248 : vector<2x32xf32>
    %cst_57 = arith.constant 1.000000e+00 : f32
    %250 = vector.broadcast %cst_57 : f32 to vector<2x32xf32>
    %251 = arith.addf %250, %249 : vector<2x32xf32>
    %252 = arith.divf %250, %251 : vector<2x32xf32>
    %253 = vector.extract_strided_slice %243 {offsets = [0, 32], sizes = [2, 32], strides = [1, 1]} : vector<2x96xf32> to vector<2x32xf32>
    %254 = vector.extract_strided_slice %244 {offsets = [0, 32], sizes = [2, 32], strides = [1, 1]} : vector<2x96xf32> to vector<2x32xf32>
    %255 = arith.addf %253, %254 : vector<2x32xf32>
    %256 = arith.negf %255 : vector<2x32xf32>
    %257 = math.exp %256 : vector<2x32xf32>
    %cst_58 = arith.constant 1.000000e+00 : f32
    %258 = vector.broadcast %cst_58 : f32 to vector<2x32xf32>
    %259 = arith.addf %258, %257 : vector<2x32xf32>
    %260 = arith.divf %258, %259 : vector<2x32xf32>
    %261 = vector.extract_strided_slice %243 {offsets = [0, 64], sizes = [2, 32], strides = [1, 1]} : vector<2x96xf32> to vector<2x32xf32>
    %262 = vector.extract_strided_slice %244 {offsets = [0, 64], sizes = [2, 32], strides = [1, 1]} : vector<2x96xf32> to vector<2x32xf32>
    %263 = arith.mulf %252, %262 : vector<2x32xf32>
    %264 = arith.addf %261, %263 : vector<2x32xf32>
    %265 = math.tanh %264 : vector<2x32xf32>
    %cst_59 = arith.constant 1.000000e+00 : f32
    %266 = vector.broadcast %cst_59 : f32 to vector<2x32xf32>
    %267 = arith.subf %266, %260 : vector<2x32xf32>
    %268 = arith.mulf %267, %265 : vector<2x32xf32>
    %269 = arith.mulf %260, %206 : vector<2x32xf32>
    %270 = arith.addf %268, %269 : vector<2x32xf32>
    %c4_i32 = arith.constant 4 : i32
    %c2_i32_60 = arith.constant 2 : i32
    %271 = arith.muli %c4_i32, %c2_i32_60 : i32
    %272 = arith.index_cast %271 : i32 to index
    %c0_61 = arith.constant 0 : index
    %273 = vector.load %arg12[%272, %c0_61] : memref<16x96xf32, #tpu.memory_space<vmem>>, vector<2x96xf32>
    %cst_62 = arith.constant dense<0.000000e+00> : vector<2x96xf32>
    %274 = tpu.matmul %238, %0, %cst_62 {dimension_numbers = #tpu.dot_dimension_numbers<[1], [0], [0], [1], [0, 0, 1, 1], [], []>} : vector<2x32xf32>, vector<32x96xf32>, vector<2x96xf32> -> vector<2x96xf32>
    %275 = vector.broadcast %1 : vector<1x96xf32> to vector<2x96xf32>
    %276 = arith.addf %274, %275 : vector<2x96xf32>
    %277 = vector.extract_strided_slice %273 {offsets = [0, 0], sizes = [2, 32], strides = [1, 1]} : vector<2x96xf32> to vector<2x32xf32>
    %278 = vector.extract_strided_slice %276 {offsets = [0, 0], sizes = [2, 32], strides = [1, 1]} : vector<2x96xf32> to vector<2x32xf32>
    %279 = arith.addf %277, %278 : vector<2x32xf32>
    %280 = arith.negf %279 : vector<2x32xf32>
    %281 = math.exp %280 : vector<2x32xf32>
    %cst_63 = arith.constant 1.000000e+00 : f32
    %282 = vector.broadcast %cst_63 : f32 to vector<2x32xf32>
    %283 = arith.addf %282, %281 : vector<2x32xf32>
    %284 = arith.divf %282, %283 : vector<2x32xf32>
    %285 = vector.extract_strided_slice %273 {offsets = [0, 32], sizes = [2, 32], strides = [1, 1]} : vector<2x96xf32> to vector<2x32xf32>
    %286 = vector.extract_strided_slice %276 {offsets = [0, 32], sizes = [2, 32], strides = [1, 1]} : vector<2x96xf32> to vector<2x32xf32>
    %287 = arith.addf %285, %286 : vector<2x32xf32>
    %288 = arith.negf %287 : vector<2x32xf32>
    %289 = math.exp %288 : vector<2x32xf32>
    %cst_64 = arith.constant 1.000000e+00 : f32
    %290 = vector.broadcast %cst_64 : f32 to vector<2x32xf32>
    %291 = arith.addf %290, %289 : vector<2x32xf32>
    %292 = arith.divf %290, %291 : vector<2x32xf32>
    %293 = vector.extract_strided_slice %273 {offsets = [0, 64], sizes = [2, 32], strides = [1, 1]} : vector<2x96xf32> to vector<2x32xf32>
    %294 = vector.extract_strided_slice %276 {offsets = [0, 64], sizes = [2, 32], strides = [1, 1]} : vector<2x96xf32> to vector<2x32xf32>
    %295 = arith.mulf %284, %294 : vector<2x32xf32>
    %296 = arith.addf %293, %295 : vector<2x32xf32>
    %297 = math.tanh %296 : vector<2x32xf32>
    %cst_65 = arith.constant 1.000000e+00 : f32
    %298 = vector.broadcast %cst_65 : f32 to vector<2x32xf32>
    %299 = arith.subf %298, %292 : vector<2x32xf32>
    %300 = arith.mulf %299, %297 : vector<2x32xf32>
    %301 = arith.mulf %292, %238 : vector<2x32xf32>
    %302 = arith.addf %300, %301 : vector<2x32xf32>
    %303 = tpu.concatenate %302, %270 in 1 : vector<2x32xf32>, vector<2x32xf32> -> vector<2x64xf32>
    %cst_66 = arith.constant dense<0.000000e+00> : vector<2x192xf32>
    %304 = tpu.matmul %303, %2, %cst_66 {dimension_numbers = #tpu.dot_dimension_numbers<[1], [0], [0], [1], [0, 0, 1, 1], [], []>} : vector<2x64xf32>, vector<64x192xf32>, vector<2x192xf32> -> vector<2x192xf32>
    %305 = vector.broadcast %3 : vector<1x192xf32> to vector<2x192xf32>
    %306 = arith.addf %304, %305 : vector<2x192xf32>
    %307 = vector.extract_strided_slice %306 {offsets = [0, 0], sizes = [2, 96], strides = [1, 1]} : vector<2x192xf32> to vector<2x96xf32>
    %308 = vector.extract_strided_slice %306 {offsets = [0, 96], sizes = [2, 96], strides = [1, 1]} : vector<2x192xf32> to vector<2x96xf32>
    %309 = vector.extract_strided_slice %307 {offsets = [0, 0], sizes = [2, 32], strides = [1, 1]} : vector<2x96xf32> to vector<2x32xf32>
    %310 = vector.extract_strided_slice %308 {offsets = [0, 0], sizes = [2, 32], strides = [1, 1]} : vector<2x96xf32> to vector<2x32xf32>
    %311 = arith.addf %309, %310 : vector<2x32xf32>
    %312 = arith.negf %311 : vector<2x32xf32>
    %313 = math.exp %312 : vector<2x32xf32>
    %cst_67 = arith.constant 1.000000e+00 : f32
    %314 = vector.broadcast %cst_67 : f32 to vector<2x32xf32>
    %315 = arith.addf %314, %313 : vector<2x32xf32>
    %316 = arith.divf %314, %315 : vector<2x32xf32>
    %317 = vector.extract_strided_slice %307 {offsets = [0, 32], sizes = [2, 32], strides = [1, 1]} : vector<2x96xf32> to vector<2x32xf32>
    %318 = vector.extract_strided_slice %308 {offsets = [0, 32], sizes = [2, 32], strides = [1, 1]} : vector<2x96xf32> to vector<2x32xf32>
    %319 = arith.addf %317, %318 : vector<2x32xf32>
    %320 = arith.negf %319 : vector<2x32xf32>
    %321 = math.exp %320 : vector<2x32xf32>
    %cst_68 = arith.constant 1.000000e+00 : f32
    %322 = vector.broadcast %cst_68 : f32 to vector<2x32xf32>
    %323 = arith.addf %322, %321 : vector<2x32xf32>
    %324 = arith.divf %322, %323 : vector<2x32xf32>
    %325 = vector.extract_strided_slice %307 {offsets = [0, 64], sizes = [2, 32], strides = [1, 1]} : vector<2x96xf32> to vector<2x32xf32>
    %326 = vector.extract_strided_slice %308 {offsets = [0, 64], sizes = [2, 32], strides = [1, 1]} : vector<2x96xf32> to vector<2x32xf32>
    %327 = arith.mulf %316, %326 : vector<2x32xf32>
    %328 = arith.addf %325, %327 : vector<2x32xf32>
    %329 = math.tanh %328 : vector<2x32xf32>
    %cst_69 = arith.constant 1.000000e+00 : f32
    %330 = vector.broadcast %cst_69 : f32 to vector<2x32xf32>
    %331 = arith.subf %330, %324 : vector<2x32xf32>
    %332 = arith.mulf %331, %329 : vector<2x32xf32>
    %333 = arith.mulf %324, %270 : vector<2x32xf32>
    %334 = arith.addf %332, %333 : vector<2x32xf32>
    %c5_i32 = arith.constant 5 : i32
    %c2_i32_70 = arith.constant 2 : i32
    %335 = arith.muli %c5_i32, %c2_i32_70 : i32
    %336 = arith.index_cast %335 : i32 to index
    %c0_71 = arith.constant 0 : index
    %337 = vector.load %arg12[%336, %c0_71] : memref<16x96xf32, #tpu.memory_space<vmem>>, vector<2x96xf32>
    %cst_72 = arith.constant dense<0.000000e+00> : vector<2x96xf32>
    %338 = tpu.matmul %302, %0, %cst_72 {dimension_numbers = #tpu.dot_dimension_numbers<[1], [0], [0], [1], [0, 0, 1, 1], [], []>} : vector<2x32xf32>, vector<32x96xf32>, vector<2x96xf32> -> vector<2x96xf32>
    %339 = vector.broadcast %1 : vector<1x96xf32> to vector<2x96xf32>
    %340 = arith.addf %338, %339 : vector<2x96xf32>
    %341 = vector.extract_strided_slice %337 {offsets = [0, 0], sizes = [2, 32], strides = [1, 1]} : vector<2x96xf32> to vector<2x32xf32>
    %342 = vector.extract_strided_slice %340 {offsets = [0, 0], sizes = [2, 32], strides = [1, 1]} : vector<2x96xf32> to vector<2x32xf32>
    %343 = arith.addf %341, %342 : vector<2x32xf32>
    %344 = arith.negf %343 : vector<2x32xf32>
    %345 = math.exp %344 : vector<2x32xf32>
    %cst_73 = arith.constant 1.000000e+00 : f32
    %346 = vector.broadcast %cst_73 : f32 to vector<2x32xf32>
    %347 = arith.addf %346, %345 : vector<2x32xf32>
    %348 = arith.divf %346, %347 : vector<2x32xf32>
    %349 = vector.extract_strided_slice %337 {offsets = [0, 32], sizes = [2, 32], strides = [1, 1]} : vector<2x96xf32> to vector<2x32xf32>
    %350 = vector.extract_strided_slice %340 {offsets = [0, 32], sizes = [2, 32], strides = [1, 1]} : vector<2x96xf32> to vector<2x32xf32>
    %351 = arith.addf %349, %350 : vector<2x32xf32>
    %352 = arith.negf %351 : vector<2x32xf32>
    %353 = math.exp %352 : vector<2x32xf32>
    %cst_74 = arith.constant 1.000000e+00 : f32
    %354 = vector.broadcast %cst_74 : f32 to vector<2x32xf32>
    %355 = arith.addf %354, %353 : vector<2x32xf32>
    %356 = arith.divf %354, %355 : vector<2x32xf32>
    %357 = vector.extract_strided_slice %337 {offsets = [0, 64], sizes = [2, 32], strides = [1, 1]} : vector<2x96xf32> to vector<2x32xf32>
    %358 = vector.extract_strided_slice %340 {offsets = [0, 64], sizes = [2, 32], strides = [1, 1]} : vector<2x96xf32> to vector<2x32xf32>
    %359 = arith.mulf %348, %358 : vector<2x32xf32>
    %360 = arith.addf %357, %359 : vector<2x32xf32>
    %361 = math.tanh %360 : vector<2x32xf32>
    %cst_75 = arith.constant 1.000000e+00 : f32
    %362 = vector.broadcast %cst_75 : f32 to vector<2x32xf32>
    %363 = arith.subf %362, %356 : vector<2x32xf32>
    %364 = arith.mulf %363, %361 : vector<2x32xf32>
    %365 = arith.mulf %356, %302 : vector<2x32xf32>
    %366 = arith.addf %364, %365 : vector<2x32xf32>
    %367 = tpu.concatenate %366, %334 in 1 : vector<2x32xf32>, vector<2x32xf32> -> vector<2x64xf32>
    %cst_76 = arith.constant dense<0.000000e+00> : vector<2x192xf32>
    %368 = tpu.matmul %367, %2, %cst_76 {dimension_numbers = #tpu.dot_dimension_numbers<[1], [0], [0], [1], [0, 0, 1, 1], [], []>} : vector<2x64xf32>, vector<64x192xf32>, vector<2x192xf32> -> vector<2x192xf32>
    %369 = vector.broadcast %3 : vector<1x192xf32> to vector<2x192xf32>
    %370 = arith.addf %368, %369 : vector<2x192xf32>
    %371 = vector.extract_strided_slice %370 {offsets = [0, 0], sizes = [2, 96], strides = [1, 1]} : vector<2x192xf32> to vector<2x96xf32>
    %372 = vector.extract_strided_slice %370 {offsets = [0, 96], sizes = [2, 96], strides = [1, 1]} : vector<2x192xf32> to vector<2x96xf32>
    %373 = vector.extract_strided_slice %371 {offsets = [0, 0], sizes = [2, 32], strides = [1, 1]} : vector<2x96xf32> to vector<2x32xf32>
    %374 = vector.extract_strided_slice %372 {offsets = [0, 0], sizes = [2, 32], strides = [1, 1]} : vector<2x96xf32> to vector<2x32xf32>
    %375 = arith.addf %373, %374 : vector<2x32xf32>
    %376 = arith.negf %375 : vector<2x32xf32>
    %377 = math.exp %376 : vector<2x32xf32>
    %cst_77 = arith.constant 1.000000e+00 : f32
    %378 = vector.broadcast %cst_77 : f32 to vector<2x32xf32>
    %379 = arith.addf %378, %377 : vector<2x32xf32>
    %380 = arith.divf %378, %379 : vector<2x32xf32>
    %381 = vector.extract_strided_slice %371 {offsets = [0, 32], sizes = [2, 32], strides = [1, 1]} : vector<2x96xf32> to vector<2x32xf32>
    %382 = vector.extract_strided_slice %372 {offsets = [0, 32], sizes = [2, 32], strides = [1, 1]} : vector<2x96xf32> to vector<2x32xf32>
    %383 = arith.addf %381, %382 : vector<2x32xf32>
    %384 = arith.negf %383 : vector<2x32xf32>
    %385 = math.exp %384 : vector<2x32xf32>
    %cst_78 = arith.constant 1.000000e+00 : f32
    %386 = vector.broadcast %cst_78 : f32 to vector<2x32xf32>
    %387 = arith.addf %386, %385 : vector<2x32xf32>
    %388 = arith.divf %386, %387 : vector<2x32xf32>
    %389 = vector.extract_strided_slice %371 {offsets = [0, 64], sizes = [2, 32], strides = [1, 1]} : vector<2x96xf32> to vector<2x32xf32>
    %390 = vector.extract_strided_slice %372 {offsets = [0, 64], sizes = [2, 32], strides = [1, 1]} : vector<2x96xf32> to vector<2x32xf32>
    %391 = arith.mulf %380, %390 : vector<2x32xf32>
    %392 = arith.addf %389, %391 : vector<2x32xf32>
    %393 = math.tanh %392 : vector<2x32xf32>
    %cst_79 = arith.constant 1.000000e+00 : f32
    %394 = vector.broadcast %cst_79 : f32 to vector<2x32xf32>
    %395 = arith.subf %394, %388 : vector<2x32xf32>
    %396 = arith.mulf %395, %393 : vector<2x32xf32>
    %397 = arith.mulf %388, %334 : vector<2x32xf32>
    %398 = arith.addf %396, %397 : vector<2x32xf32>
    %c6_i32 = arith.constant 6 : i32
    %c2_i32_80 = arith.constant 2 : i32
    %399 = arith.muli %c6_i32, %c2_i32_80 : i32
    %400 = arith.index_cast %399 : i32 to index
    %c0_81 = arith.constant 0 : index
    %401 = vector.load %arg12[%400, %c0_81] : memref<16x96xf32, #tpu.memory_space<vmem>>, vector<2x96xf32>
    %cst_82 = arith.constant dense<0.000000e+00> : vector<2x96xf32>
    %402 = tpu.matmul %366, %0, %cst_82 {dimension_numbers = #tpu.dot_dimension_numbers<[1], [0], [0], [1], [0, 0, 1, 1], [], []>} : vector<2x32xf32>, vector<32x96xf32>, vector<2x96xf32> -> vector<2x96xf32>
    %403 = vector.broadcast %1 : vector<1x96xf32> to vector<2x96xf32>
    %404 = arith.addf %402, %403 : vector<2x96xf32>
    %405 = vector.extract_strided_slice %401 {offsets = [0, 0], sizes = [2, 32], strides = [1, 1]} : vector<2x96xf32> to vector<2x32xf32>
    %406 = vector.extract_strided_slice %404 {offsets = [0, 0], sizes = [2, 32], strides = [1, 1]} : vector<2x96xf32> to vector<2x32xf32>
    %407 = arith.addf %405, %406 : vector<2x32xf32>
    %408 = arith.negf %407 : vector<2x32xf32>
    %409 = math.exp %408 : vector<2x32xf32>
    %cst_83 = arith.constant 1.000000e+00 : f32
    %410 = vector.broadcast %cst_83 : f32 to vector<2x32xf32>
    %411 = arith.addf %410, %409 : vector<2x32xf32>
    %412 = arith.divf %410, %411 : vector<2x32xf32>
    %413 = vector.extract_strided_slice %401 {offsets = [0, 32], sizes = [2, 32], strides = [1, 1]} : vector<2x96xf32> to vector<2x32xf32>
    %414 = vector.extract_strided_slice %404 {offsets = [0, 32], sizes = [2, 32], strides = [1, 1]} : vector<2x96xf32> to vector<2x32xf32>
    %415 = arith.addf %413, %414 : vector<2x32xf32>
    %416 = arith.negf %415 : vector<2x32xf32>
    %417 = math.exp %416 : vector<2x32xf32>
    %cst_84 = arith.constant 1.000000e+00 : f32
    %418 = vector.broadcast %cst_84 : f32 to vector<2x32xf32>
    %419 = arith.addf %418, %417 : vector<2x32xf32>
    %420 = arith.divf %418, %419 : vector<2x32xf32>
    %421 = vector.extract_strided_slice %401 {offsets = [0, 64], sizes = [2, 32], strides = [1, 1]} : vector<2x96xf32> to vector<2x32xf32>
    %422 = vector.extract_strided_slice %404 {offsets = [0, 64], sizes = [2, 32], strides = [1, 1]} : vector<2x96xf32> to vector<2x32xf32>
    %423 = arith.mulf %412, %422 : vector<2x32xf32>
    %424 = arith.addf %421, %423 : vector<2x32xf32>
    %425 = math.tanh %424 : vector<2x32xf32>
    %cst_85 = arith.constant 1.000000e+00 : f32
    %426 = vector.broadcast %cst_85 : f32 to vector<2x32xf32>
    %427 = arith.subf %426, %420 : vector<2x32xf32>
    %428 = arith.mulf %427, %425 : vector<2x32xf32>
    %429 = arith.mulf %420, %366 : vector<2x32xf32>
    %430 = arith.addf %428, %429 : vector<2x32xf32>
    %431 = tpu.concatenate %430, %398 in 1 : vector<2x32xf32>, vector<2x32xf32> -> vector<2x64xf32>
    %cst_86 = arith.constant dense<0.000000e+00> : vector<2x192xf32>
    %432 = tpu.matmul %431, %2, %cst_86 {dimension_numbers = #tpu.dot_dimension_numbers<[1], [0], [0], [1], [0, 0, 1, 1], [], []>} : vector<2x64xf32>, vector<64x192xf32>, vector<2x192xf32> -> vector<2x192xf32>
    %433 = vector.broadcast %3 : vector<1x192xf32> to vector<2x192xf32>
    %434 = arith.addf %432, %433 : vector<2x192xf32>
    %435 = vector.extract_strided_slice %434 {offsets = [0, 0], sizes = [2, 96], strides = [1, 1]} : vector<2x192xf32> to vector<2x96xf32>
    %436 = vector.extract_strided_slice %434 {offsets = [0, 96], sizes = [2, 96], strides = [1, 1]} : vector<2x192xf32> to vector<2x96xf32>
    %437 = vector.extract_strided_slice %435 {offsets = [0, 0], sizes = [2, 32], strides = [1, 1]} : vector<2x96xf32> to vector<2x32xf32>
    %438 = vector.extract_strided_slice %436 {offsets = [0, 0], sizes = [2, 32], strides = [1, 1]} : vector<2x96xf32> to vector<2x32xf32>
    %439 = arith.addf %437, %438 : vector<2x32xf32>
    %440 = arith.negf %439 : vector<2x32xf32>
    %441 = math.exp %440 : vector<2x32xf32>
    %cst_87 = arith.constant 1.000000e+00 : f32
    %442 = vector.broadcast %cst_87 : f32 to vector<2x32xf32>
    %443 = arith.addf %442, %441 : vector<2x32xf32>
    %444 = arith.divf %442, %443 : vector<2x32xf32>
    %445 = vector.extract_strided_slice %435 {offsets = [0, 32], sizes = [2, 32], strides = [1, 1]} : vector<2x96xf32> to vector<2x32xf32>
    %446 = vector.extract_strided_slice %436 {offsets = [0, 32], sizes = [2, 32], strides = [1, 1]} : vector<2x96xf32> to vector<2x32xf32>
    %447 = arith.addf %445, %446 : vector<2x32xf32>
    %448 = arith.negf %447 : vector<2x32xf32>
    %449 = math.exp %448 : vector<2x32xf32>
    %cst_88 = arith.constant 1.000000e+00 : f32
    %450 = vector.broadcast %cst_88 : f32 to vector<2x32xf32>
    %451 = arith.addf %450, %449 : vector<2x32xf32>
    %452 = arith.divf %450, %451 : vector<2x32xf32>
    %453 = vector.extract_strided_slice %435 {offsets = [0, 64], sizes = [2, 32], strides = [1, 1]} : vector<2x96xf32> to vector<2x32xf32>
    %454 = vector.extract_strided_slice %436 {offsets = [0, 64], sizes = [2, 32], strides = [1, 1]} : vector<2x96xf32> to vector<2x32xf32>
    %455 = arith.mulf %444, %454 : vector<2x32xf32>
    %456 = arith.addf %453, %455 : vector<2x32xf32>
    %457 = math.tanh %456 : vector<2x32xf32>
    %cst_89 = arith.constant 1.000000e+00 : f32
    %458 = vector.broadcast %cst_89 : f32 to vector<2x32xf32>
    %459 = arith.subf %458, %452 : vector<2x32xf32>
    %460 = arith.mulf %459, %457 : vector<2x32xf32>
    %461 = arith.mulf %452, %398 : vector<2x32xf32>
    %462 = arith.addf %460, %461 : vector<2x32xf32>
    %c7_i32 = arith.constant 7 : i32
    %c2_i32_90 = arith.constant 2 : i32
    %463 = arith.muli %c7_i32, %c2_i32_90 : i32
    %464 = arith.index_cast %463 : i32 to index
    %c0_91 = arith.constant 0 : index
    %465 = vector.load %arg12[%464, %c0_91] : memref<16x96xf32, #tpu.memory_space<vmem>>, vector<2x96xf32>
    %cst_92 = arith.constant dense<0.000000e+00> : vector<2x96xf32>
    %466 = tpu.matmul %430, %0, %cst_92 {dimension_numbers = #tpu.dot_dimension_numbers<[1], [0], [0], [1], [0, 0, 1, 1], [], []>} : vector<2x32xf32>, vector<32x96xf32>, vector<2x96xf32> -> vector<2x96xf32>
    %467 = vector.broadcast %1 : vector<1x96xf32> to vector<2x96xf32>
    %468 = arith.addf %466, %467 : vector<2x96xf32>
    %469 = vector.extract_strided_slice %465 {offsets = [0, 0], sizes = [2, 32], strides = [1, 1]} : vector<2x96xf32> to vector<2x32xf32>
    %470 = vector.extract_strided_slice %468 {offsets = [0, 0], sizes = [2, 32], strides = [1, 1]} : vector<2x96xf32> to vector<2x32xf32>
    %471 = arith.addf %469, %470 : vector<2x32xf32>
    %472 = arith.negf %471 : vector<2x32xf32>
    %473 = math.exp %472 : vector<2x32xf32>
    %cst_93 = arith.constant 1.000000e+00 : f32
    %474 = vector.broadcast %cst_93 : f32 to vector<2x32xf32>
    %475 = arith.addf %474, %473 : vector<2x32xf32>
    %476 = arith.divf %474, %475 : vector<2x32xf32>
    %477 = vector.extract_strided_slice %465 {offsets = [0, 32], sizes = [2, 32], strides = [1, 1]} : vector<2x96xf32> to vector<2x32xf32>
    %478 = vector.extract_strided_slice %468 {offsets = [0, 32], sizes = [2, 32], strides = [1, 1]} : vector<2x96xf32> to vector<2x32xf32>
    %479 = arith.addf %477, %478 : vector<2x32xf32>
    %480 = arith.negf %479 : vector<2x32xf32>
    %481 = math.exp %480 : vector<2x32xf32>
    %cst_94 = arith.constant 1.000000e+00 : f32
    %482 = vector.broadcast %cst_94 : f32 to vector<2x32xf32>
    %483 = arith.addf %482, %481 : vector<2x32xf32>
    %484 = arith.divf %482, %483 : vector<2x32xf32>
    %485 = vector.extract_strided_slice %465 {offsets = [0, 64], sizes = [2, 32], strides = [1, 1]} : vector<2x96xf32> to vector<2x32xf32>
    %486 = vector.extract_strided_slice %468 {offsets = [0, 64], sizes = [2, 32], strides = [1, 1]} : vector<2x96xf32> to vector<2x32xf32>
    %487 = arith.mulf %476, %486 : vector<2x32xf32>
    %488 = arith.addf %485, %487 : vector<2x32xf32>
    %489 = math.tanh %488 : vector<2x32xf32>
    %cst_95 = arith.constant 1.000000e+00 : f32
    %490 = vector.broadcast %cst_95 : f32 to vector<2x32xf32>
    %491 = arith.subf %490, %484 : vector<2x32xf32>
    %492 = arith.mulf %491, %489 : vector<2x32xf32>
    %493 = arith.mulf %484, %430 : vector<2x32xf32>
    %494 = arith.addf %492, %493 : vector<2x32xf32>
    %495 = tpu.concatenate %494, %462 in 1 : vector<2x32xf32>, vector<2x32xf32> -> vector<2x64xf32>
    %cst_96 = arith.constant dense<0.000000e+00> : vector<2x192xf32>
    %496 = tpu.matmul %495, %2, %cst_96 {dimension_numbers = #tpu.dot_dimension_numbers<[1], [0], [0], [1], [0, 0, 1, 1], [], []>} : vector<2x64xf32>, vector<64x192xf32>, vector<2x192xf32> -> vector<2x192xf32>
    %497 = vector.broadcast %3 : vector<1x192xf32> to vector<2x192xf32>
    %498 = arith.addf %496, %497 : vector<2x192xf32>
    %499 = vector.extract_strided_slice %498 {offsets = [0, 0], sizes = [2, 96], strides = [1, 1]} : vector<2x192xf32> to vector<2x96xf32>
    %500 = vector.extract_strided_slice %498 {offsets = [0, 96], sizes = [2, 96], strides = [1, 1]} : vector<2x192xf32> to vector<2x96xf32>
    %501 = vector.extract_strided_slice %499 {offsets = [0, 0], sizes = [2, 32], strides = [1, 1]} : vector<2x96xf32> to vector<2x32xf32>
    %502 = vector.extract_strided_slice %500 {offsets = [0, 0], sizes = [2, 32], strides = [1, 1]} : vector<2x96xf32> to vector<2x32xf32>
    %503 = arith.addf %501, %502 : vector<2x32xf32>
    %504 = arith.negf %503 : vector<2x32xf32>
    %505 = math.exp %504 : vector<2x32xf32>
    %cst_97 = arith.constant 1.000000e+00 : f32
    %506 = vector.broadcast %cst_97 : f32 to vector<2x32xf32>
    %507 = arith.addf %506, %505 : vector<2x32xf32>
    %508 = arith.divf %506, %507 : vector<2x32xf32>
    %509 = vector.extract_strided_slice %499 {offsets = [0, 32], sizes = [2, 32], strides = [1, 1]} : vector<2x96xf32> to vector<2x32xf32>
    %510 = vector.extract_strided_slice %500 {offsets = [0, 32], sizes = [2, 32], strides = [1, 1]} : vector<2x96xf32> to vector<2x32xf32>
    %511 = arith.addf %509, %510 : vector<2x32xf32>
    %512 = arith.negf %511 : vector<2x32xf32>
    %513 = math.exp %512 : vector<2x32xf32>
    %cst_98 = arith.constant 1.000000e+00 : f32
    %514 = vector.broadcast %cst_98 : f32 to vector<2x32xf32>
    %515 = arith.addf %514, %513 : vector<2x32xf32>
    %516 = arith.divf %514, %515 : vector<2x32xf32>
    %517 = vector.extract_strided_slice %499 {offsets = [0, 64], sizes = [2, 32], strides = [1, 1]} : vector<2x96xf32> to vector<2x32xf32>
    %518 = vector.extract_strided_slice %500 {offsets = [0, 64], sizes = [2, 32], strides = [1, 1]} : vector<2x96xf32> to vector<2x32xf32>
    %519 = arith.mulf %508, %518 : vector<2x32xf32>
    %520 = arith.addf %517, %519 : vector<2x32xf32>
    %521 = math.tanh %520 : vector<2x32xf32>
    %cst_99 = arith.constant 1.000000e+00 : f32
    %522 = vector.broadcast %cst_99 : f32 to vector<2x32xf32>
    %523 = arith.subf %522, %516 : vector<2x32xf32>
    %524 = arith.mulf %523, %521 : vector<2x32xf32>
    %525 = arith.mulf %516, %462 : vector<2x32xf32>
    %526 = arith.addf %524, %525 : vector<2x32xf32>
    %c8_i32 = arith.constant 8 : i32
    %c0_100 = arith.constant 0 : index
    %c0_101 = arith.constant 0 : index
    %c0_102 = arith.constant 0 : index
    %527 = vector.load %arg11[%c0_100, %c0_101, %c0_102] : memref<2x2x32xf32, #tpu.memory_space<vmem>>, vector<1x2x32xf32>
    %528 = vector.shape_cast %527 : vector<1x2x32xf32> to vector<2x32xf32>
    %529 = vector.shape_cast %494 : vector<2x32xf32> to vector<1x2x32xf32>
    tpu.vector_store %arg11[%c0_100, %c0_101, %c0_102], %529 {strides = array<i32>} : memref<2x2x32xf32, #tpu.memory_space<vmem>>, vector<1x2x32xf32>,
    %c1_103 = arith.constant 1 : index
    %c0_104 = arith.constant 0 : index
    %c0_105 = arith.constant 0 : index
    %530 = vector.load %arg11[%c1_103, %c0_104, %c0_105] : memref<2x2x32xf32, #tpu.memory_space<vmem>>, vector<1x2x32xf32>
    %531 = vector.shape_cast %530 : vector<1x2x32xf32> to vector<2x32xf32>
    %532 = vector.shape_cast %526 : vector<2x32xf32> to vector<1x2x32xf32>
    tpu.vector_store %arg11[%c1_103, %c0_104, %c0_105], %532 {strides = array<i32>} : memref<2x2x32xf32, #tpu.memory_space<vmem>>, vector<1x2x32xf32>,
    %c0_106 = arith.constant 0 : index
    %c0_107 = arith.constant 0 : index
    %533 = vector.load %arg8[%c0_106, %c0_107] : memref<32x3xf32, #tpu.memory_space<vmem>>, vector<32x3xf32>
    %cst_108 = arith.constant dense<0.000000e+00> : vector<2x3xf32>
    %534 = tpu.matmul %526, %533, %cst_108 {dimension_numbers = #tpu.dot_dimension_numbers<[1], [0], [0], [1], [0, 0, 1, 1], [], []>} : vector<2x32xf32>, vector<32x3xf32>, vector<2x3xf32> -> vector<2x3xf32>
    %c0_109 = arith.constant 0 : index
    %c0_110 = arith.constant 0 : index
    %535 = vector.load %arg9[%c0_109, %c0_110] : memref<1x3xf32, #tpu.memory_space<vmem>>, vector<1x3xf32>
    %536 = vector.broadcast %535 : vector<1x3xf32> to vector<2x3xf32>
    %537 = arith.addf %534, %536 : vector<2x3xf32>
    %c0_111 = arith.constant 0 : index
    %c0_112 = arith.constant 0 : index
    %538 = vector.load %arg10[%c0_111, %c0_112] : memref<2x3xf32, #tpu.memory_space<vmem>>, vector<2x3xf32>
    tpu.vector_store %arg10[%c0_111, %c0_112], %537 {strides = array<i32>} : memref<2x3xf32, #tpu.memory_space<vmem>>, vector<2x3xf32>,
    return
  }
}

</mosaic_0001>

<bundles_post_ra>
// kernel: tpu_custom_call.1
= control target key start
LH: loop header
LB: loop body
LE: loop exit
PB: predicated region body
PF: predicated region fallthrough
CT: control target
= control target key end

     0   :  { %17 = vsyncpa [#allocation4], 0  ;;  %s3162_s0 = inlined_call_operand.vmem [shape: f32[16,4], index: 0, kind: input, shape index: {}]   ;;  %s3163_s1 = inlined_call_operand.vmem [shape: f32[2,2,32], index: 1, kind: input, shape index: {}]   ;;  %s3164_s2 = inlined_call_operand.vmem [shape: f32[4,96], index: 2, kind: input, shape index: {}]   ;;  %s3165_s3 = inlined_call_operand.vmem [shape: f32[1,96], index: 3, kind: input, shape index: {}]   ;;  %s3166_s4 = inlined_call_operand.vmem [shape: f32[32,96], index: 4, kind: input, shape index: {}]   ;;  %s3167_s5 = inlined_call_operand.vmem [shape: f32[1,96], index: 5, kind: input, shape index: {}]   ;;  %s3168_s6 = inlined_call_operand.hbm [shape: f32[64,192], index: 6, kind: input, shape index: {}]   ;;  %s3169_s7 = inlined_call_operand.vmem [shape: f32[1,192], index: 7, kind: input, shape index: {}]   ;;  %s3170_s8 = inlined_call_operand.vmem [shape: f32[32,3], index: 8, kind: input, shape index: {}]   ;;  %s3171_s9 = inlined_call_operand.vmem [shape: f32[1,3], index: 9, kind: input, shape index: {}]   ;;  %s3172_s10 = inlined_call_operand.hbm [shape: f32[2,3], index: 10, kind: output, shape index: {0}]   ;;  %s3173_s11 = inlined_call_operand.hbm [shape: f32[2,2,32], index: 11, kind: output, shape index: {1}]  }
   0x1   :  { %18 = vsyncpa [#allocation5], 0 }
   0x2   :  { %19 = vsyncpa [#allocation8], 0  ;;  %s2667_s17 = smov [#allocation3]   ;;  %s2595_s21 = scalar_lea.hbm %s3168_s6, 2048 }
   0x3   :  { %s37_s18 = sshll.u32 %s2667_s17, 4  ;;  %p2596_p0 = scmp.ne.s32.totalorder %s3168_s6, %s2595_s21  ;;  %s38_s18 = int_to_ptr.vmem [resolvable:$true] %s37_s18 }
   0x4   :  { %p2599_p1 = scmp.lt.u32.totalorder %s2595_s21, %s3168_s6 }
   0x6   :  { %p2601_p2 = pnand %p2599_p1, %p2596_p0 }
   0x8   :  { %2604 = shalt.err (!%p2601_p2)
}
   0x9   :  { %s2605_s26 = scalar_lea.vmem %s38_s18, 2048  ;;  %p2610_p4 = scmp.lt.s32.totalorder %s38_s18, %s38_s18 }
   0xa   :  { %p2606_p3 = scmp.ne.s32.totalorder %s38_s18, %s2605_s26  ;;  %p2611_p5 = scmp.lt.s32.totalorder %s2605_s26, %s2605_s26 }
   0xc   :  { %p2612_p6 = por %p2611_p5, %p2610_p4 }
   0xe   :  { %p2613_p7 = pnand %p2612_p6, %p2606_p3 }
  0x10   :  { %2616 = shalt.err (!%p2613_p7)
}
  0x11   :  { %s2668_s27 = smov 256   ;;  %s2669_s28 = smov 16  }
  0x12   :  { %43 = dma.hbm_to_vmem [thread:$0]  %s3168_s6, 2048, %s38_s18, [#allocation4], %s2668_s27, %s2668_s27, %s2669_s28  }
  0x13   :  { %2661 = dma.done.wait [#allocation4], 2048  }
  0x14   :  { %2662 = vsyncadd [#allocation4], 4294965248  ;;  %v2670_v0 = vmov 0.0|0.0   ;;  %vm2671_vm0 = vmmov 0   ;;  %v2672_v1 = vmov 0.0   ;;  %vm92_vm1 = vcmask 1043456  }
  0x15   :  { %2272 = vmatprep.subr.bf16.mxu1 %v2670_v0  ;;  %2181 = vmatprep.mubr.msk.f32.mxu1 %vm2671_vm0, %v2672_v1  ;;  %vm85_vm2 = vcmask 31744   ;;  %v77_v2 = vld [vmem:[%s3164_s2] sm:$0xf]  ;;  %v76_v4 = vld [vmem:[%s3162_s0 + $0x8] sm:$0xff]  ;;  %v55_v7 = vld [vmem:[%s3166_s4 + $0x10] sm:$0xff]  ;;  %vm184_vm3 = vcmask 261120  }
  0x16   :  { %v75_v3 = vld [vmem:[%s3162_s0] sm:$0xff]  ;;  %2168 = vmatprep.subr.msk.mxu0 %vm92_vm1, %v77_v2  ;;  %v54_v6 = vld [vmem:[%s3166_s4 + $0x8] sm:$0xff]  ;;  %v56_v9 = vld [vmem:[%s3166_s4 + $0x18] sm:$0xff]  ;;  %vm171_vm4 = vcmask 785408   ;;  %s2673_s28 = smov 64   ;;  %s2675_s29 = smov 32  }
  0x17   :  { %2170 = vmatprep.mubr.msk.f32.mxu0 %vm85_vm2, %v75_v3  ;;  %v53_v5 = vld [vmem:[%s3166_s4] sm:$0xff]  ;;  %2169 = vmatpush3.msk.msra.mxu0 %vm92_vm1, %v77_v2  ;;  %v2778_v10 = vpack.c.bf16 %v56_v9, %v55_v7  ;;  %v59_v31 = vld [vmem:[#allocation3 + $0x8] sm:$0xff]  ;;  %v61_v32 = vld [vmem:[#allocation3 + $0x18] sm:$0xff]  ;;  %vm307_vm5 = vcmask 523264   ;;  %vm1948_vm6 = vcmask 254976  }
  0x18   :  { %v2772_v8 = vpack.c.bf16 %v54_v6, %v53_v5  ;;  %2171 = vmatmul.mubr.msk.f32.vlgmr.msra.gmra.mrb[0].mxu0 %vm85_vm2, %v76_v4  ;;  %v2786_v11 = vld [vmem:[%s3163_s1] sm:$0x3]  ;;  %v58_v33 = vld [vmem:[#allocation3] sm:$0xff]  ;;  %v2807_v34 = vpack.c.bf16 %v61_v32, %v59_v31  ;;  %v63_v36 = vld [vmem:[#allocation3 + $0x28] sm:$0xff]  ;;  %v297_v4 = vlaneseq }
  0x19   :  { %375 = vmatprep.mubr.f32.mxu0 %v2672_v1  ;;  %v2072_v12 = vld [vmem:[%s3165_s3] ss:$0 sm:$0xff]  ;;  %v65_v37 = vld [vmem:[#allocation3 + $0x38] sm:$0xff]  ;;  %v62_v40 = vld [vmem:[#allocation3 + $0x20] sm:$0xff]  ;;  %s2674_s3 = smov 96  }
  0x1a   :  { %2274 = vmatpush3.bf16.msra.mxu1 %v2772_v8  ;;  %v2802_v17 = vld [vmem:[%s3167_s5] ss:$0 sm:$0xff]  ;;  %v2811_v39 = vpack.c.bf16 %v65_v37, %v63_v36  ;;  %v67_v42 = vld [vmem:[#allocation3 + $0x48] sm:$0xff]  ;;  %2279 = vmatprep.subr.bf16.mxu0 %v2807_v34  ;;  %v69_v43 = vld [vmem:[#allocation3 + $0x58] sm:$0xff]  ;;  %v298_v5 = vshrl.u32 %v297_v4, 7 }
  0x1b   :  { %2275 = vmatprep.subr.bf16.mxu1 %v2670_v0  ;;  %v60_v35 = vld [vmem:[#allocation3 + $0x10] sm:$0xff]  ;;  %v2820_v46 = vpack.c.bf16 %v69_v43, %v67_v42  ;;  %v66_v47 = vld [vmem:[#allocation3 + $0x40] sm:$0xff]  ;;  %v71_v49 = vld [vmem:[#allocation3 + $0x68] sm:$0xff] }
  0x1c   :  { %v2809_v38 = vpack.c.bf16 %v60_v35, %v58_v33  ;;  %v64_v41 = vld [vmem:[#allocation3 + $0x30] sm:$0xff]  ;;  %v73_v50 = vld [vmem:[#allocation3 + $0x78] sm:$0xff]  ;;  %v70_v53 = vld [vmem:[#allocation3 + $0x60] sm:$0xff]  ;;  %v303_v7 = vsub.s32 1, %v298_v5 }
  0x1d   :  { %v2816_v45 = vpack.c.bf16 %v64_v41, %v62_v40  ;;  %v68_v48 = vld [vmem:[#allocation3 + $0x50] sm:$0xff]  ;;  %v2828_v52 = vpack.c.bf16 %v73_v50, %v71_v49 }
  0x1e   :  { %2277 = vmatpush3.bf16.msra.mxu1 %v2778_v10  ;;  %2281 = vmatpush1.bf16.msra.mxu0 %v2809_v38  ;;  %v2823_v51 = vpack.c.bf16 %v68_v48, %v66_v47  ;;  %v72_v54 = vld [vmem:[#allocation3 + $0x70] sm:$0xff] }
  0x1f   :  { %2294 = vmatprep.subr.bf16.mxu1 %v2670_v0  ;;  %2283 = vmatprep.subr.bf16.mxu0 %v2811_v39  ;;  %v2076_v55 = vld [vmem:[%s3163_s1 + $0x2] sm:$0x3]  ;;  %v2834_v56 = vpack.c.bf16 %v72_v54, %v70_v53  ;;  %v74_v6 = vld [vmem:[%s3169_s7] sm:$0x3] }
  0x20   :  { %v2865_v9 = vrot.slane %v74_v6, %v303_v7 }
  0x21   :  { %2182 = vmatmul.mubr.msk.f32.vlgmr.msra.gmra.mrb[0].mxu1 %vm184_vm3, %v2786_v11 }
  0x22   :  { %2296 = vmatpush3.bf16.msra.mxu1 %v2772_v8  ;;  %2192 = vmatprep.mubr.msk.f32.mxu1 %vm2671_vm0, %v2672_v1 }
  0x23   :  { %2297 = vmatprep.subr.bf16.mxu1 %v2670_v0  ;;  %2285 = vmatpush1.bf16.msra.mxu0 %v2816_v45 }
  0x24   :  { %2287 = vmatprep.subr.bf16.mxu0 %v2820_v46 }
  0x26   :  { %2299 = vmatpush3.bf16.msra.mxu1 %v2778_v10 }
  0x27   :  { %2301 = vmatprep.subr.bf16.mxu1 %v2807_v34  ;;  %2289 = vmatpush1.bf16.msra.mxu0 %v2823_v51 }
  0x28   :  { %2291 = vmatprep.subr.bf16.mxu0 %v2828_v52 }
  0x2b   :  { %2293 = vmatpush1.bf16.msra.mxu0 %v2834_v56 }
  0x2c   :  { %2316 = vmatprep.subr.bf16.mxu0 %v2670_v0 }
  0xeb   :  { %v2172_v13 = vpop.f32.mrb[0].mxu0 }
  0xec   :  { %v168_v14 = vadd.f32 %v2172_v13, %v2072_v12  ;;  %v162_v15 = vpop.f32.mrb[1].mxu0 }
  0xed   :  { %v163_v16 = vadd.f32 %v2072_v12, %v162_v15 }
  0xee   :  { %173 = vst.msk [vmem:[#allocation2 + $0x8] sm:$0xff] %vm171_vm4, %v168_v14 }
  0xef   :  { %172 = vst.msk [vmem:[#allocation2] sm:$0xff] %vm171_vm4, %v163_v16 }
  0xf4   :  { %v254_v18 = vpop.f32.mrb[0].mxu1 }
  0xf5   :  { %v255_v19 = vadd.f32 %v2802_v17, %v254_v18  ;;  %v2183_v20 = vpop.f32.mrb[1].mxu1 }
  0xf6   :  { %v177_v21 = vld [vmem:[#allocation2] sm:$0x3]  ;;  %v422_v16 = vld [vmem:[#allocation2 + $0x2] sm:$0x3] }
  0xf7   :  { %266 = vrot.lane.b32.xlu0 %v255_v19, %s2673_s28  ;;  %v258_v22 = vadd.f32 %v255_v19, %v177_v21 }
  0xf9   :  { %v2079_v23 = vmul.f32 -1.442695, %v258_v22 }
  0xfb   :  { %2466 = vpow2.f32 %v2079_v23 }
 0x105   :  { %v2467_v24 = vpop.eup %2466 }
 0x106   :  { %v262_v25 = vadd.f32 1.0, %v2467_v24 }
 0x108   :  { %2468 = vrcp.f32 %v262_v25 }
 0x112   :  { %v2469_v26 = vpop.eup %2468 }
 0x113   :  { %v276_v58 = vsub.f32 1.0, %v2469_v26 }
 0x169   :  { %v267_v27 = vpop.permute.xlu0 %266 }
 0x16a   :  { %v269_v28 = vmul.f32 %v2469_v26, %v267_v27  ;;  %v299_v27 = vsub.s32 0, %v298_v5 }
 0x16c   :  { %271 = vrot.lane.b32.xlu0 %v269_v28, %s2673_s28  ;;  %v2870_v28 = vrot.slane %v74_v6, %v299_v27 }
 0x1de   :  { %v272_v29 = vpop.permute.xlu0 %271 }
 0x1df   :  { %v274_v30 = vadd.f32 %v272_v29, %v177_v21 }
 0x1e1   :  { %2470 = vtanh.f32 %v274_v30 }
 0x1eb   :  { %v2471_v44 = vpop.eup %2470 }
 0x1ec   :  { %278 = vrot.lane.b32.xlu1 %v2471_v44, %s2674_s3 }
 0x1f0   :  { %282 = vrot.lane.b32.xlu1 %v2786_v11, %s2675_s29 }
 0x1f4   :  { %292 = vrot.lane.b32.xlu1 %v2076_v55, %s2675_s29 }
 0x25e   :  { %v279_v57 = vpop.permute.xlu1 %278 }
 0x25f   :  { %v281_v60 = vmul.f32 %v279_v57, %v276_v58 }
 0x262   :  { %v283_v59 = vpop.permute.xlu1 %282 }
 0x263   :  { %v285_v61 = vmul.f32 %v2469_v26, %v283_v59 }
 0x265   :  { %v286_v62 = vadd.f32 %v285_v61, %v281_v60 }
 0x266   :  { %v2841_v63 = vpop.permute.xlu1 %292 }
 0x267   :  { %288 = vrot.lane.b32.xlu0 %v286_v62, %s2674_s3 }
 0x2d9   :  { %v289_v2 = vpop.permute.xlu0 %288 }
 0x2da   :  { %v295_v3 = vsel %vm184_vm3, %v289_v2, %v2841_v63  ;;  %2193 = vmatmul.mubr.msk.f32.vlgmr.msra.gmra.mrb[2].mxu1 %vm184_vm3, %v289_v2 }
 0x2db   :  { %2080 = vmatmul.mubr.msk.f32.vlgmr.msra.gmra.mrb[2].mxu0 %vm307_vm5, %v295_v3  ;;  %2303 = vmatpush1.bf16.msra.mxu1 %v2809_v38 }
 0x2dc   :  { %2318 = vmatpush3.bf16.msra.mxu0 %v2772_v8  ;;  %2203 = vmatprep.mubr.msk.f32.mxu0 %vm2671_vm0, %v2672_v1 }
 0x2dd   :  { %2319 = vmatprep.subr.bf16.mxu0 %v2670_v0  ;;  %2305 = vmatprep.subr.bf16.mxu1 %v2811_v39 }
 0x2de   :  { %593 = vmatprep.mubr.f32.mxu1 %v2672_v1 }
 0x2df   :  { %2307 = vmatpush1.bf16.msra.mxu1 %v2816_v45 }
 0x2e0   :  { %2321 = vmatpush3.bf16.msra.mxu0 %v2778_v10  ;;  %2309 = vmatprep.subr.bf16.mxu1 %v2820_v46 }
 0x2e1   :  { %2323 = vmatprep.subr.bf16.mxu0 %v2807_v34 }
 0x2e3   :  { %2311 = vmatpush1.bf16.msra.mxu1 %v2823_v51 }
 0x2e4   :  { %2313 = vmatprep.subr.bf16.mxu1 %v2828_v52 }
 0x2e7   :  { %2315 = vmatpush1.bf16.msra.mxu1 %v2834_v56 }
 0x2e8   :  { %2338 = vmatprep.subr.bf16.mxu1 %v2670_v0 }
 0x3ad   :  { %v491_v11 = vpop.f32.mrb[2].mxu1 }
 0x3ae   :  { %v492_v12 = vadd.f32 %v2802_v17, %v491_v11  ;;  %v377_v13 = vpop.f32.mrb[2].mxu0  ;;  %v2194_v14 = vpop.f32.mrb[3].mxu1 }
 0x3af   :  { %v379_v15 = vpop.f32.mrb[3].mxu0  ;;  %v378_v30 = vadd.f32 %v377_v13, %v2870_v28 }
 0x3b0   :  { %503 = vrot.lane.b32.xlu0 %v492_v12, %s2673_s28  ;;  %v495_v18 = vadd.f32 %v492_v12, %v422_v16  ;;  %v380_v37 = vadd.f32 %v379_v15, %v2865_v9 }
 0x3b2   :  { %v2084_v19 = vmul.f32 -1.442695, %v495_v18 }
 0x3b4   :  { %2472 = vpow2.f32 %v2084_v19 }
 0x3be   :  { %v2473_v20 = vpop.eup %2472 }
 0x3bf   :  { %v499_v21 = vadd.f32 1.0, %v2473_v20 }
 0x3c1   :  { %2474 = vrcp.f32 %v499_v21 }
 0x3cb   :  { %v2475_v22 = vpop.eup %2474 }
 0x3cc   :  { %v513_v31 = vsub.f32 1.0, %v2475_v22  ;;  %v519_v33 = vmul.f32 %v2475_v22, %v286_v62 }
 0x422   :  { %v504_v23 = vpop.permute.xlu0 %503 }
 0x423   :  { %v506_v24 = vmul.f32 %v2475_v22, %v504_v23 }
 0x425   :  { %508 = vrot.lane.b32.xlu1 %v506_v24, %s2673_s28 }
 0x497   :  { %v509_v25 = vpop.permute.xlu1 %508 }
 0x498   :  { %v511_v26 = vadd.f32 %v509_v25, %v422_v16 }
 0x49a   :  { %2476 = vtanh.f32 %v511_v26 }
 0x4a4   :  { %v2477_v29 = vpop.eup %2476 }
 0x4a5   :  { %515 = vrot.lane.b32.xlu0 %v2477_v29, %s2674_s3 }
 0x4a9   :  { %383 = vrot.lane.b32.xlu0 %v378_v30, %s2675_s29 }
 0x517   :  { %v516_v32 = vpop.permute.xlu0 %515 }
 0x518   :  { %v518_v35 = vmul.f32 %v516_v32, %v513_v31 }
 0x51a   :  { %v2875_v36 = vadd.f32 %v519_v33, %v518_v35 }
 0x51b   :  { %v384_v40 = vpop.permute.xlu0 %383 }
 0x51c   :  { %522 = vrot.lane.b32.xlu1 %v2875_v36, %s2674_s3  ;;  %v386_v41 = vadd.f32 %v384_v40, %v378_v30 }
 0x51e   :  { %v2081_v42 = vmul.f32 -1.442695, %v386_v41 }
 0x520   :  { %404 = vrot.lane.b32.xlu1 %v380_v37, %s2674_s3  ;;  %2478 = vpow2.f32 %v2081_v42 }
 0x524   :  { %394 = vrot.lane.b32.xlu1 %v380_v37, %s2675_s29 }
 0x52a   :  { %v2479_v43 = vpop.eup %2478 }
 0x52b   :  { %v390_v44 = vadd.f32 1.0, %v2479_v43 }
 0x52d   :  { %2480 = vrcp.f32 %v390_v44 }
 0x537   :  { %v2481_v48 = vpop.eup %2480 }
 0x58e   :  { %v523_v47 = vpop.permute.xlu1 %522 }
 0x58f   :  { %2204 = vmatmul.mubr.msk.f32.vlgmr.msra.gmra.mrb[4].mxu0 %vm184_vm3, %v523_v47 }
 0x590   :  { %2325 = vmatpush1.bf16.msra.mxu0 %v2809_v38  ;;  %811 = vmatprep.mubr.f32.mxu0 %v2672_v1 }
 0x591   :  { %2327 = vmatprep.subr.bf16.mxu0 %v2811_v39 }
 0x592   :  { %v405_v49 = vpop.permute.xlu1 %404 }
 0x593   :  { %v407_v50 = vmul.f32 %v2481_v48, %v405_v49 }
 0x594   :  { %2329 = vmatpush1.bf16.msra.mxu0 %v2816_v45 }
 0x595   :  { %409 = vrot.lane.b32.xlu0 %v407_v50, %s2673_s28  ;;  %2331 = vmatprep.subr.bf16.mxu0 %v2820_v46 }
 0x596   :  { %v395_v57 = vpop.permute.xlu1 %394 }
 0x597   :  { %v397_v58 = vadd.f32 %v395_v57, %v378_v30 }
 0x598   :  { %2333 = vmatpush1.bf16.msra.mxu0 %v2823_v51 }
 0x599   :  { %2335 = vmatprep.subr.bf16.mxu0 %v2828_v52  ;;  %v2082_v62 = vmul.f32 -1.442695, %v397_v58 }
 0x59c   :  { %2337 = vmatpush1.bf16.msra.mxu0 %v2834_v56 }
 0x59d   :  { %2360 = vmatprep.subr.bf16.mxu0 %v2670_v0 }
 0x607   :  { %v410_v53 = vpop.permute.xlu0 %409 }
 0x608   :  { %v412_v54 = vadd.f32 %v410_v53, %v378_v30 }
 0x60a   :  { %2482 = vtanh.f32 %v412_v54 }
 0x60b   :  { %2484 = vpow2.f32 %v2082_v62 }
 0x614   :  { %v2483_v55 = vpop.eup %2482 }
 0x615   :  { %416 = vrot.lane.b32.xlu0 %v2483_v55, %s2674_s3  ;;  %v2485_v2 = vpop.eup %2484 }
 0x616   :  { %v401_v3 = vadd.f32 1.0, %v2485_v2 }
 0x618   :  { %2486 = vrcp.f32 %v401_v3 }
 0x622   :  { %v2487_v4 = vpop.eup %2486 }
 0x623   :  { %v414_v5 = vsub.f32 1.0, %v2487_v4  ;;  %v420_v7 = vmul.f32 %v2487_v4, %v2841_v63  ;;  %v640_v63 = vld [vmem:[#allocation2 + $0x4] sm:$0x3] }
 0x662   :  { %v709_v59 = vpop.f32.mrb[4].mxu0 }
 0x663   :  { %v710_v60 = vadd.f32 %v2802_v17, %v709_v59  ;;  %v2205_v61 = vpop.f32.mrb[5].mxu0 }
 0x665   :  { %721 = vrot.lane.b32.xlu1 %v710_v60, %s2673_s28  ;;  %v713_v14 = vadd.f32 %v710_v60, %v640_v63 }
 0x667   :  { %v2089_v15 = vmul.f32 -1.442695, %v713_v14 }
 0x669   :  { %2488 = vpow2.f32 %v2089_v15 }
 0x673   :  { %v2489_v16 = vpop.eup %2488 }
 0x674   :  { %v717_v18 = vadd.f32 1.0, %v2489_v16 }
 0x676   :  { %2490 = vrcp.f32 %v717_v18 }
 0x680   :  { %v2491_v19 = vpop.eup %2490 }
 0x681   :  { %v731_v30 = vsub.f32 1.0, %v2491_v19  ;;  %v737_v32 = vmul.f32 %v2491_v19, %v2875_v36 }
 0x687   :  { %v417_v6 = vpop.permute.xlu0 %416 }
 0x688   :  { %v419_v11 = vmul.f32 %v417_v6, %v414_v5 }
 0x68a   :  { %v2897_v12 = vadd.f32 %v420_v7, %v419_v11 }
 0x68c   :  { %v525_v13 = vsel %vm184_vm3, %v523_v47, %v2897_v12 }
 0x68d   :  { %2085 = vmatmul.mubr.msk.f32.vlgmr.msra.gmra.mrb[4].mxu1 %vm307_vm5, %v525_v13 }
 0x68e   :  { %2340 = vmatpush3.bf16.msra.mxu1 %v2772_v8  ;;  %2214 = vmatprep.mubr.msk.f32.mxu1 %vm2671_vm0, %v2672_v1 }
 0x68f   :  { %2341 = vmatprep.subr.bf16.mxu1 %v2670_v0 }
 0x692   :  { %2343 = vmatpush3.bf16.msra.mxu1 %v2778_v10 }
 0x693   :  { %2345 = vmatprep.subr.bf16.mxu1 %v2807_v34 }
 0x6d7   :  { %v722_v20 = vpop.permute.xlu1 %721 }
 0x6d8   :  { %v724_v21 = vmul.f32 %v2491_v19, %v722_v20 }
 0x6da   :  { %726 = vrot.lane.b32.xlu0 %v724_v21, %s2673_s28 }
 0x74c   :  { %v727_v22 = vpop.permute.xlu0 %726 }
 0x74d   :  { %v729_v23 = vadd.f32 %v727_v22, %v640_v63 }
 0x74f   :  { %2492 = vtanh.f32 %v729_v23 }
 0x759   :  { %v2493_v24 = vpop.eup %2492 }
 0x75a   :  { %733 = vrot.lane.b32.xlu1 %v2493_v24, %s2674_s3 }
 0x760   :  { %v595_v25 = vpop.f32.mrb[4].mxu1 }
 0x761   :  { %v596_v26 = vadd.f32 %v595_v25, %v2870_v28  ;;  %v597_v27 = vpop.f32.mrb[5].mxu1 }
 0x762   :  { %v598_v29 = vadd.f32 %v597_v27, %v2865_v9 }
 0x763   :  { %601 = vrot.lane.b32.xlu0 %v596_v26, %s2675_s29 }
 0x767   :  { %622 = vrot.lane.b32.xlu0 %v598_v29, %s2674_s3 }
 0x76b   :  { %612 = vrot.lane.b32.xlu0 %v598_v29, %s2675_s29 }
 0x7cc   :  { %v734_v31 = vpop.permute.xlu1 %733 }
 0x7cd   :  { %v736_v33 = vmul.f32 %v734_v31, %v731_v30 }
 0x7cf   :  { %v2916_v35 = vadd.f32 %v737_v32, %v736_v33 }
 0x7d1   :  { %740 = vrot.lane.b32.xlu1 %v2916_v35, %s2674_s3 }
 0x7d5   :  { %v602_v37 = vpop.permute.xlu0 %601 }
 0x7d6   :  { %v604_v40 = vadd.f32 %v602_v37, %v596_v26 }
 0x7d8   :  { %v2086_v41 = vmul.f32 -1.442695, %v604_v40 }
 0x7d9   :  { %v623_v47 = vpop.permute.xlu0 %622 }
 0x7da   :  { %2494 = vpow2.f32 %v2086_v41 }
 0x7dd   :  { %v613_v54 = vpop.permute.xlu0 %612 }
 0x7de   :  { %v615_v55 = vadd.f32 %v613_v54, %v596_v26 }
 0x7e0   :  { %v2087_v57 = vmul.f32 -1.442695, %v615_v55 }
 0x7e4   :  { %v2495_v42 = vpop.eup %2494 }
 0x7e5   :  { %v608_v43 = vadd.f32 1.0, %v2495_v42 }
 0x7e7   :  { %2496 = vrcp.f32 %v608_v43 }
 0x7f1   :  { %v2497_v44 = vpop.eup %2496 }
 0x7f2   :  { %v625_v48 = vmul.f32 %v2497_v44, %v623_v47 }
 0x7f4   :  { %627 = vrot.lane.b32.xlu1 %v625_v48, %s2673_s28 }
 0x843   :  { %v741_v49 = vpop.permute.xlu1 %740 }
 0x844   :  { %2215 = vmatmul.mubr.msk.f32.vlgmr.msra.gmra.mrb[6].mxu1 %vm184_vm3, %v741_v49 }
 0x845   :  { %2347 = vmatpush1.bf16.msra.mxu1 %v2809_v38  ;;  %1029 = vmatprep.mubr.f32.mxu1 %v2672_v1 }
 0x846   :  { %2349 = vmatprep.subr.bf16.mxu1 %v2811_v39 }
 0x849   :  { %2351 = vmatpush1.bf16.msra.mxu1 %v2816_v45 }
 0x84a   :  { %2353 = vmatprep.subr.bf16.mxu1 %v2820_v46 }
 0x84d   :  { %2355 = vmatpush1.bf16.msra.mxu1 %v2823_v51 }
 0x84e   :  { %2357 = vmatprep.subr.bf16.mxu1 %v2828_v52 }
 0x851   :  { %2359 = vmatpush1.bf16.msra.mxu1 %v2834_v56 }
 0x852   :  { %2382 = vmatprep.subr.bf16.mxu1 %v2670_v0 }
 0x866   :  { %v628_v36 = vpop.permute.xlu1 %627 }
 0x867   :  { %v630_v50 = vadd.f32 %v628_v36, %v596_v26 }
 0x869   :  { %2498 = vtanh.f32 %v630_v50 }
 0x86a   :  { %2500 = vpow2.f32 %v2087_v57 }
 0x873   :  { %v2499_v53 = vpop.eup %2498 }
 0x874   :  { %634 = vrot.lane.b32.xlu1 %v2499_v53, %s2674_s3  ;;  %v2501_v58 = vpop.eup %2500 }
 0x875   :  { %v619_v59 = vadd.f32 1.0, %v2501_v58 }
 0x877   :  { %2502 = vrcp.f32 %v619_v59 }
 0x881   :  { %v2503_v60 = vpop.eup %2502 }
 0x882   :  { %v632_v61 = vsub.f32 1.0, %v2503_v60  ;;  %v638_v3 = vmul.f32 %v2503_v60, %v2897_v12  ;;  %v858_v12 = vld [vmem:[#allocation2 + $0x6] sm:$0x3] }
 0x8e6   :  { %v635_v62 = vpop.permute.xlu1 %634 }
 0x8e7   :  { %v637_v2 = vmul.f32 %v635_v62, %v632_v61 }
 0x8e9   :  { %v2933_v4 = vadd.f32 %v638_v3, %v637_v2 }
 0x8eb   :  { %v743_v5 = vsel %vm184_vm3, %v741_v49, %v2933_v4 }
 0x8ec   :  { %2090 = vmatmul.mubr.msk.f32.vlgmr.msra.gmra.mrb[6].mxu0 %vm307_vm5, %v743_v5 }
 0x8ed   :  { %2362 = vmatpush3.bf16.msra.mxu0 %v2772_v8  ;;  %2225 = vmatprep.mubr.msk.f32.mxu0 %vm2671_vm0, %v2672_v1 }
 0x8ee   :  { %2363 = vmatprep.subr.bf16.mxu0 %v2670_v0 }
 0x8f1   :  { %2365 = vmatpush3.bf16.msra.mxu0 %v2778_v10 }
 0x8f2   :  { %2367 = vmatprep.subr.bf16.mxu0 %v2807_v34 }
 0x917   :  { %v927_v6 = vpop.f32.mrb[6].mxu1 }
 0x918   :  { %v928_v7 = vadd.f32 %v2802_v17, %v927_v6  ;;  %v2216_v11 = vpop.f32.mrb[7].mxu1 }
 0x91a   :  { %939 = vrot.lane.b32.xlu0 %v928_v7, %s2673_s28  ;;  %v931_v13 = vadd.f32 %v928_v7, %v858_v12  ;;  %v1076_v7 = vld [vmem:[#allocation2 + $0x8] sm:$0x3] }
 0x91c   :  { %v2094_v63 = vmul.f32 -1.442695, %v931_v13 }
 0x91e   :  { %2504 = vpow2.f32 %v2094_v63 }
 0x928   :  { %v2505_v14 = vpop.eup %2504 }
 0x929   :  { %v935_v15 = vadd.f32 1.0, %v2505_v14 }
 0x92b   :  { %2506 = vrcp.f32 %v935_v15 }
 0x935   :  { %v2507_v16 = vpop.eup %2506 }
 0x936   :  { %v949_v33 = vsub.f32 1.0, %v2507_v16  ;;  %v955_v40 = vmul.f32 %v2507_v16, %v2916_v35 }
 0x98c   :  { %v940_v18 = vpop.permute.xlu0 %939 }
 0x98d   :  { %v942_v19 = vmul.f32 %v2507_v16, %v940_v18 }
 0x98f   :  { %944 = vrot.lane.b32.xlu1 %v942_v19, %s2673_s28 }
 0x9bf   :  { %v813_v20 = vpop.f32.mrb[6].mxu0 }
 0x9c0   :  { %v814_v21 = vadd.f32 %v813_v20, %v2870_v28  ;;  %v815_v22 = vpop.f32.mrb[7].mxu0 }
 0x9c1   :  { %v816_v26 = vadd.f32 %v815_v22, %v2865_v9 }
 0x9c2   :  { %819 = vrot.lane.b32.xlu1 %v814_v21, %s2675_s29 }
 0xa01   :  { %v945_v23 = vpop.permute.xlu1 %944 }
 0xa02   :  { %v947_v24 = vadd.f32 %v945_v23, %v858_v12 }
 0xa04   :  { %2508 = vtanh.f32 %v947_v24 }
 0xa0e   :  { %v2509_v25 = vpop.eup %2508 }
 0xa0f   :  { %951 = vrot.lane.b32.xlu0 %v2509_v25, %s2674_s3 }
 0xa13   :  { %840 = vrot.lane.b32.xlu0 %v816_v26, %s2674_s3 }
 0xa34   :  { %v820_v27 = vpop.permute.xlu1 %819 }
 0xa35   :  { %v822_v29 = vadd.f32 %v820_v27, %v814_v21 }
 0xa37   :  { %v2091_v30 = vmul.f32 -1.442695, %v822_v29 }
 0xa39   :  { %2510 = vpow2.f32 %v2091_v30 }
 0xa43   :  { %v2511_v31 = vpop.eup %2510 }
 0xa44   :  { %v826_v32 = vadd.f32 1.0, %v2511_v31 }
 0xa46   :  { %2512 = vrcp.f32 %v826_v32 }
 0xa50   :  { %v2513_v43 = vpop.eup %2512 }
 0xa81   :  { %v952_v37 = vpop.permute.xlu0 %951 }
 0xa82   :  { %v954_v41 = vmul.f32 %v952_v37, %v949_v33 }
 0xa84   :  { %v2953_v42 = vadd.f32 %v955_v40, %v954_v41 }
 0xa85   :  { %v841_v44 = vpop.permute.xlu0 %840 }
 0xa86   :  { %v843_v47 = vmul.f32 %v2513_v43, %v841_v44  ;;  %958 = vrot.lane.b32.xlu1 %v2953_v42, %s2674_s3 }
 0xa88   :  { %845 = vrot.lane.b32.xlu0 %v843_v47, %s2673_s28 }
 0xa8a   :  { %830 = vrot.lane.b32.xlu1 %v816_v26, %s2675_s29 }
 0xaf8   :  { %v959_v48 = vpop.permute.xlu1 %958 }
 0xaf9   :  { %2226 = vmatmul.mubr.msk.f32.vlgmr.msra.gmra.mrb[8].mxu0 %vm184_vm3, %v959_v48 }
 0xafa   :  { %v846_v49 = vpop.permute.xlu0 %845  ;;  %2369 = vmatpush1.bf16.msra.mxu0 %v2809_v38  ;;  %1247 = vmatprep.mubr.f32.mxu0 %v2672_v1 }
 0xafb   :  { %v848_v35 = vadd.f32 %v846_v49, %v814_v21  ;;  %2371 = vmatprep.subr.bf16.mxu0 %v2811_v39 }
 0xafc   :  { %v831_v50 = vpop.permute.xlu1 %830 }
 0xafd   :  { %2514 = vtanh.f32 %v848_v35  ;;  %v833_v53 = vadd.f32 %v831_v50, %v814_v21 }
 0xafe   :  { %2373 = vmatpush1.bf16.msra.mxu0 %v2816_v45 }
 0xaff   :  { %2375 = vmatprep.subr.bf16.mxu0 %v2820_v46  ;;  %v2092_v54 = vmul.f32 -1.442695, %v833_v53 }
 0xb01   :  { %2516 = vpow2.f32 %v2092_v54 }
 0xb02   :  { %2377 = vmatpush1.bf16.msra.mxu0 %v2823_v51 }
 0xb03   :  { %2379 = vmatprep.subr.bf16.mxu0 %v2828_v52 }
 0xb06   :  { %2381 = vmatpush1.bf16.msra.mxu0 %v2834_v56 }
 0xb07   :  { %v2515_v36 = vpop.eup %2514  ;;  %2404 = vmatprep.subr.bf16.mxu0 %v2670_v0 }
 0xb08   :  { %852 = vrot.lane.b32.xlu0 %v2515_v36, %s2674_s3 }
 0xb0b   :  { %v2517_v55 = vpop.eup %2516 }
 0xb0c   :  { %v837_v57 = vadd.f32 1.0, %v2517_v55 }
 0xb0e   :  { %2518 = vrcp.f32 %v837_v57 }
 0xb18   :  { %v2519_v58 = vpop.eup %2518 }
 0xb19   :  { %v850_v59 = vsub.f32 1.0, %v2519_v58  ;;  %v856_v62 = vmul.f32 %v2519_v58, %v2933_v4 }
 0xb7a   :  { %v853_v60 = vpop.permute.xlu0 %852 }
 0xb7b   :  { %v855_v61 = vmul.f32 %v853_v60, %v850_v59 }
 0xb7d   :  { %v2971_v2 = vadd.f32 %v856_v62, %v855_v61 }
 0xb7f   :  { %v961_v3 = vsel %vm184_vm3, %v959_v48, %v2971_v2 }
 0xb80   :  { %2095 = vmatmul.mubr.msk.f32.vlgmr.msra.gmra.mrb[8].mxu1 %vm307_vm5, %v961_v3 }
 0xb81   :  { %2384 = vmatpush3.bf16.msra.mxu1 %v2772_v8  ;;  %2236 = vmatprep.mubr.msk.f32.mxu1 %vm2671_vm0, %v2672_v1 }
 0xb82   :  { %2385 = vmatprep.subr.bf16.mxu1 %v2670_v0 }
 0xb85   :  { %2387 = vmatpush3.bf16.msra.mxu1 %v2778_v10 }
 0xb86   :  { %2389 = vmatprep.subr.bf16.mxu1 %v2807_v34 }
 0xbcc   :  { %v1145_v5 = vpop.f32.mrb[8].mxu0 }
 0xbcd   :  { %v1146_v4 = vadd.f32 %v2802_v17, %v1145_v5  ;;  %v2227_v6 = vpop.f32.mrb[9].mxu0 }
 0xbcf   :  { %1157 = vrot.lane.b32.xlu1 %v1146_v4, %s2673_s28  ;;  %v1149_v11 = vadd.f32 %v1146_v4, %v1076_v7 }
 0xbd1   :  { %v2099_v12 = vmul.f32 -1.442695, %v1149_v11  ;;  %v1294_v11 = vld [vmem:[#allocation2 + $0xa] sm:$0x3] }
 0xbd3   :  { %2520 = vpow2.f32 %v2099_v12 }
 0xbdd   :  { %v2521_v13 = vpop.eup %2520 }
 0xbde   :  { %v1153_v63 = vadd.f32 1.0, %v2521_v13 }
 0xbe0   :  { %2522 = vrcp.f32 %v1153_v63 }
 0xbea   :  { %v2523_v14 = vpop.eup %2522 }
 0xbeb   :  { %v1167_v37 = vsub.f32 1.0, %v2523_v14  ;;  %v1173_v41 = vmul.f32 %v2523_v14, %v2953_v42 }
 0xc41   :  { %v1158_v15 = vpop.permute.xlu1 %1157 }
 0xc42   :  { %v1160_v16 = vmul.f32 %v2523_v14, %v1158_v15 }
 0xc44   :  { %1162 = vrot.lane.b32.xlu0 %v1160_v16, %s2673_s28 }
 0xc53   :  { %v1031_v18 = vpop.f32.mrb[8].mxu1 }
 0xc54   :  { %v1032_v19 = vadd.f32 %v1031_v18, %v2870_v28  ;;  %v1033_v20 = vpop.f32.mrb[9].mxu1 }
 0xc55   :  { %v1034_v21 = vadd.f32 %v1033_v20, %v2865_v9 }
 0xc56   :  { %1037 = vrot.lane.b32.xlu1 %v1032_v19, %s2675_s29 }
 0xc5a   :  { %1058 = vrot.lane.b32.xlu1 %v1034_v21, %s2674_s3 }
 0xcb6   :  { %v1163_v22 = vpop.permute.xlu0 %1162 }
 0xcb7   :  { %v1165_v23 = vadd.f32 %v1163_v22, %v1076_v7 }
 0xcb9   :  { %2524 = vtanh.f32 %v1165_v23 }
 0xcc3   :  { %v2525_v24 = vpop.eup %2524 }
 0xcc4   :  { %1169 = vrot.lane.b32.xlu0 %v2525_v24, %s2674_s3 }
 0xcc8   :  { %v1038_v25 = vpop.permute.xlu1 %1037 }
 0xcc9   :  { %v1040_v26 = vadd.f32 %v1038_v25, %v1032_v19 }
 0xccb   :  { %v2096_v27 = vmul.f32 -1.442695, %v1040_v26 }
 0xccc   :  { %v1059_v32 = vpop.permute.xlu1 %1058 }
 0xccd   :  { %2526 = vpow2.f32 %v2096_v27 }
 0xcd7   :  { %v2527_v29 = vpop.eup %2526 }
 0xcd8   :  { %v1044_v30 = vadd.f32 1.0, %v2527_v29 }
 0xcda   :  { %2528 = vrcp.f32 %v1044_v30 }
 0xce4   :  { %v2529_v31 = vpop.eup %2528 }
 0xce5   :  { %v1061_v33 = vmul.f32 %v2529_v31, %v1059_v32 }
 0xce7   :  { %1063 = vrot.lane.b32.xlu1 %v1061_v33, %s2673_s28 }
 0xd36   :  { %v1170_v40 = vpop.permute.xlu0 %1169 }
 0xd37   :  { %v1172_v43 = vmul.f32 %v1170_v40, %v1167_v37 }
 0xd39   :  { %v2992_v44 = vadd.f32 %v1173_v41, %v1172_v43 }
 0xd3b   :  { %1176 = vrot.lane.b32.xlu0 %v2992_v44, %s2674_s3 }
 0xd3f   :  { %1048 = vrot.lane.b32.xlu0 %v1034_v21, %s2675_s29 }
 0xd59   :  { %v1064_v47 = vpop.permute.xlu1 %1063 }
 0xd5a   :  { %v1066_v48 = vadd.f32 %v1064_v47, %v1032_v19 }
 0xd5c   :  { %2530 = vtanh.f32 %v1066_v48 }
 0xd66   :  { %v2531_v49 = vpop.eup %2530 }
 0xd67   :  { %1070 = vrot.lane.b32.xlu1 %v2531_v49, %s2674_s3 }
 0xdad   :  { %v1177_v35 = vpop.permute.xlu0 %1176 }
 0xdae   :  { %2237 = vmatmul.mubr.msk.f32.vlgmr.msra.gmra.mrb[10].mxu1 %vm184_vm3, %v1177_v35 }
 0xdaf   :  { %2391 = vmatpush1.bf16.msra.mxu1 %v2809_v38  ;;  %1465 = vmatprep.mubr.f32.mxu1 %v2672_v1 }
 0xdb0   :  { %2393 = vmatprep.subr.bf16.mxu1 %v2811_v39 }
 0xdb1   :  { %v1049_v42 = vpop.permute.xlu0 %1048 }
 0xdb2   :  { %v1051_v36 = vadd.f32 %v1049_v42, %v1032_v19 }
 0xdb3   :  { %2395 = vmatpush1.bf16.msra.mxu1 %v2816_v45 }
 0xdb4   :  { %2397 = vmatprep.subr.bf16.mxu1 %v2820_v46  ;;  %v2097_v50 = vmul.f32 -1.442695, %v1051_v36 }
 0xdb6   :  { %2532 = vpow2.f32 %v2097_v50 }
 0xdb7   :  { %2399 = vmatpush1.bf16.msra.mxu1 %v2823_v51 }
 0xdb8   :  { %2401 = vmatprep.subr.bf16.mxu1 %v2828_v52 }
 0xdbb   :  { %2403 = vmatpush1.bf16.msra.mxu1 %v2834_v56 }
 0xdbc   :  { %2426 = vmatprep.subr.bf16.mxu1 %v2670_v0 }
 0xdc0   :  { %v2533_v53 = vpop.eup %2532 }
 0xdc1   :  { %v1055_v54 = vadd.f32 1.0, %v2533_v53 }
 0xdc3   :  { %2534 = vrcp.f32 %v1055_v54 }
 0xdcd   :  { %v2535_v55 = vpop.eup %2534 }
 0xdce   :  { %v1068_v57 = vsub.f32 1.0, %v2535_v55  ;;  %v1074_v59 = vmul.f32 %v2535_v55, %v2971_v2 }
 0xdd9   :  { %v1071_v58 = vpop.permute.xlu1 %1070 }
 0xdda   :  { %v1073_v60 = vmul.f32 %v1071_v58, %v1068_v57 }
 0xddc   :  { %v3009_v61 = vadd.f32 %v1074_v59, %v1073_v60 }
 0xdde   :  { %v1179_v62 = vsel %vm184_vm3, %v1177_v35, %v3009_v61 }
 0xddf   :  { %2100 = vmatmul.mubr.msk.f32.vlgmr.msra.gmra.mrb[10].mxu0 %vm307_vm5, %v1179_v62 }
 0xde0   :  { %2406 = vmatpush3.bf16.msra.mxu0 %v2772_v8  ;;  %2247 = vmatprep.mubr.msk.f32.mxu0 %vm2671_vm0, %v2672_v1 }
 0xde1   :  { %2407 = vmatprep.subr.bf16.mxu0 %v2670_v0 }
 0xde4   :  { %2409 = vmatpush3.bf16.msra.mxu0 %v2778_v10 }
 0xde5   :  { %2411 = vmatprep.subr.bf16.mxu0 %v2807_v34 }
 0xe81   :  { %v1363_v2 = vpop.f32.mrb[10].mxu1 }
 0xe82   :  { %v1364_v3 = vadd.f32 %v2802_v17, %v1363_v2  ;;  %v2238_v5 = vpop.f32.mrb[11].mxu1 }
 0xe84   :  { %1375 = vrot.lane.b32.xlu0 %v1364_v3, %s2673_s28  ;;  %v1367_v12 = vadd.f32 %v1364_v3, %v1294_v11 }
 0xe86   :  { %v2104_v13 = vmul.f32 -1.442695, %v1367_v12 }
 0xe88   :  { %2536 = vpow2.f32 %v2104_v13 }
 0xe92   :  { %v2537_v63 = vpop.eup %2536 }
 0xe93   :  { %v1371_v14 = vadd.f32 1.0, %v2537_v63 }
 0xe95   :  { %2538 = vrcp.f32 %v1371_v14 }
 0xe9f   :  { %v2539_v15 = vpop.eup %2538 }
 0xea0   :  { %v1385_v37 = vsub.f32 1.0, %v2539_v15  ;;  %v1391_v41 = vmul.f32 %v2539_v15, %v2992_v44 }
 0xeb2   :  { %v1249_v4 = vpop.f32.mrb[10].mxu0 }
 0xeb3   :  { %v1250_v6 = vadd.f32 %v1249_v4, %v2870_v28  ;;  %v1251_v7 = vpop.f32.mrb[11].mxu0 }
 0xeb4   :  { %v1252_v19 = vadd.f32 %v1251_v7, %v2865_v9 }
 0xeb5   :  { %1255 = vrot.lane.b32.xlu0 %v1250_v6, %s2675_s29 }
 0xef6   :  { %v1376_v16 = vpop.permute.xlu0 %1375 }
 0xef7   :  { %v1378_v18 = vmul.f32 %v2539_v15, %v1376_v16 }
 0xef9   :  { %1380 = vrot.lane.b32.xlu1 %v1378_v18, %s2673_s28 }
 0xefd   :  { %1276 = vrot.lane.b32.xlu1 %v1252_v19, %s2674_s3 }
 0xf27   :  { %v1256_v20 = vpop.permute.xlu0 %1255 }
 0xf28   :  { %v1258_v21 = vadd.f32 %v1256_v20, %v1250_v6 }
 0xf2a   :  { %v2101_v22 = vmul.f32 -1.442695, %v1258_v21 }
 0xf2c   :  { %2540 = vpow2.f32 %v2101_v22 }
 0xf36   :  { %v2541_v23 = vpop.eup %2540 }
 0xf37   :  { %v1262_v24 = vadd.f32 1.0, %v2541_v23 }
 0xf39   :  { %2542 = vrcp.f32 %v1262_v24 }
 0xf43   :  { %v2543_v27 = vpop.eup %2542 }
 0xf6b   :  { %v1381_v25 = vpop.permute.xlu1 %1380 }
 0xf6c   :  { %v1383_v26 = vadd.f32 %v1381_v25, %v1294_v11 }
 0xf6e   :  { %2544 = vtanh.f32 %v1383_v26 }
 0xf6f   :  { %v1277_v29 = vpop.permute.xlu1 %1276 }
 0xf70   :  { %v1279_v30 = vmul.f32 %v2543_v27, %v1277_v29 }
 0xf72   :  { %1281 = vrot.lane.b32.xlu1 %v1279_v30, %s2673_s28 }
 0xf76   :  { %1266 = vrot.lane.b32.xlu1 %v1252_v19, %s2675_s29 }
 0xf78   :  { %v2545_v31 = vpop.eup %2544 }
 0xf79   :  { %1387 = vrot.lane.b32.xlu0 %v2545_v31, %s2674_s3 }
 0xfe4   :  { %v1282_v32 = vpop.permute.xlu1 %1281 }
 0xfe5   :  { %v1284_v33 = vadd.f32 %v1282_v32, %v1250_v6 }
 0xfe7   :  { %2546 = vtanh.f32 %v1284_v33 }
 0xfe8   :  { %v1267_v49 = vpop.permute.xlu1 %1266 }
 0xfe9   :  { %v1269_v35 = vadd.f32 %v1267_v49, %v1250_v6 }
 0xfeb   :  { %v1388_v40 = vpop.permute.xlu0 %1387  ;;  %v2102_v42 = vmul.f32 -1.442695, %v1269_v35 }
 0xfec   :  { %v1390_v43 = vmul.f32 %v1388_v40, %v1385_v37 }
 0xfed   :  { %2548 = vpow2.f32 %v2102_v42 }
 0xfee   :  { %v3031_v47 = vadd.f32 %v1391_v41, %v1390_v43 }
 0xff0   :  { %1394 = vrot.lane.b32.xlu0 %v3031_v47, %s2674_s3 }
 0xff1   :  { %v2547_v48 = vpop.eup %2546 }
 0xff4   :  { %1288 = vrot.lane.b32.xlu0 %v2547_v48, %s2674_s3 }
 0xff7   :  { %v2549_v36 = vpop.eup %2548 }
 0xff8   :  { %v1273_v50 = vadd.f32 1.0, %v2549_v36 }
 0xffa   :  { %2550 = vrcp.f32 %v1273_v50 }
0x1004   :  { %v2551_v53 = vpop.eup %2550 }
0x1005   :  { %v1286_v44 = vsub.f32 1.0, %v2551_v53  ;;  %v1292_v58 = vmul.f32 %v2551_v53, %v3009_v61 }
0x1062   :  { %v1395_v54 = vpop.permute.xlu0 %1394 }
0x1063   :  { %2248 = vmatmul.mubr.msk.f32.vlgmr.msra.gmra.mrb[12].mxu0 %vm184_vm3, %v1395_v54 }
0x1064   :  { %2413 = vmatpush1.bf16.msra.mxu0 %v2809_v38  ;;  %1683 = vmatprep.mubr.f32.mxu0 %v2672_v1 }
0x1065   :  { %2415 = vmatprep.subr.bf16.mxu0 %v2811_v39 }
0x1066   :  { %v1289_v55 = vpop.permute.xlu0 %1288 }
0x1067   :  { %v1291_v57 = vmul.f32 %v1289_v55, %v1286_v44 }
0x1068   :  { %2417 = vmatpush1.bf16.msra.mxu0 %v2816_v45 }
0x1069   :  { %v3042_v59 = vadd.f32 %v1292_v58, %v1291_v57  ;;  %2419 = vmatprep.subr.bf16.mxu0 %v2820_v46 }
0x106b   :  { %v1397_v60 = vsel %vm184_vm3, %v1395_v54, %v3042_v59 }
0x106c   :  { %2105 = vmatmul.mubr.msk.f32.vlgmr.msra.gmra.mrb[12].mxu1 %vm307_vm5, %v1397_v60  ;;  %2421 = vmatpush1.bf16.msra.mxu0 %v2823_v51 }
0x106d   :  { %2428 = vmatpush3.bf16.msra.mxu1 %v2772_v8  ;;  %2423 = vmatprep.subr.bf16.mxu0 %v2828_v52 }
0x106e   :  { %2429 = vmatprep.subr.bf16.mxu1 %v2670_v0  ;;  %2258 = vmatprep.mubr.msk.f32.mxu1 %vm2671_vm0, %v2672_v1 }
0x1070   :  { %2425 = vmatpush1.bf16.msra.mxu0 %v2834_v56 }
0x1071   :  { %2431 = vmatpush3.bf16.msra.mxu1 %v2778_v10  ;;  %2448 = vmatprep.subr.bf16.mxu0 %v2670_v0  ;;  %v1512_v10 = vld [vmem:[#allocation2 + $0xc] sm:$0x3] }
0x1072   :  { %2433 = vmatprep.subr.bf16.mxu1 %v2807_v34 }
0x1136   :  { %v1581_v61 = vpop.f32.mrb[12].mxu0 }
0x1137   :  { %v1582_v62 = vadd.f32 %v2802_v17, %v1581_v61  ;;  %v2249_v2 = vpop.f32.mrb[13].mxu0 }
0x1139   :  { %1593 = vrot.lane.b32.xlu1 %v1582_v62, %s2673_s28  ;;  %v1585_v6 = vadd.f32 %v1582_v62, %v1512_v10 }
0x113b   :  { %v2109_v7 = vmul.f32 -1.442695, %v1585_v6 }
0x113d   :  { %2552 = vpow2.f32 %v2109_v7 }
0x113f   :  { %v1467_v8 = vpop.f32.mrb[12].mxu1 }
0x1140   :  { %v1468_v3 = vadd.f32 %v1467_v8, %v2870_v28  ;;  %v1469_v5 = vpop.f32.mrb[13].mxu1 }
0x1141   :  { %v1470_v4 = vadd.f32 %v1469_v5, %v2865_v9 }
0x1142   :  { %1473 = vrot.lane.b32.xlu0 %v1468_v3, %s2675_s29 }
0x1146   :  { %1494 = vrot.lane.b32.xlu0 %v1470_v4, %s2674_s3 }
0x1147   :  { %v2553_v34 = vpop.eup %2552 }
0x1148   :  { %v1589_v11 = vadd.f32 1.0, %v2553_v34 }
0x114a   :  { %2554 = vrcp.f32 %v1589_v11 }
0x1154   :  { %v2555_v17 = vpop.eup %2554 }
0x1155   :  { %v1603_v29 = vsub.f32 1.0, %v2555_v17  ;;  %v1609_v31 = vmul.f32 %v2555_v17, %v3031_v47 }
0x11ab   :  { %v1594_v12 = vpop.permute.xlu1 %1593 }
0x11ac   :  { %v1596_v13 = vmul.f32 %v2555_v17, %v1594_v12 }
0x11ae   :  { %1598 = vrot.lane.b32.xlu1 %v1596_v13, %s2673_s28 }
0x11b4   :  { %v1474_v63 = vpop.permute.xlu0 %1473 }
0x11b5   :  { %v1476_v14 = vadd.f32 %v1474_v63, %v1468_v3 }
0x11b7   :  { %v2106_v15 = vmul.f32 -1.442695, %v1476_v14 }
0x11b8   :  { %v1495_v20 = vpop.permute.xlu0 %1494 }
0x11b9   :  { %2556 = vpow2.f32 %v2106_v15 }
0x11c3   :  { %v2557_v16 = vpop.eup %2556 }
0x11c4   :  { %v1480_v18 = vadd.f32 1.0, %v2557_v16 }
0x11c6   :  { %2558 = vrcp.f32 %v1480_v18 }
0x11d0   :  { %v2559_v19 = vpop.eup %2558 }
0x11d1   :  { %v1497_v21 = vmul.f32 %v2559_v19, %v1495_v20 }
0x11d3   :  { %1499 = vrot.lane.b32.xlu0 %v1497_v21, %s2673_s28 }
0x1220   :  { %v1599_v22 = vpop.permute.xlu1 %1598 }
0x1221   :  { %v1601_v23 = vadd.f32 %v1599_v22, %v1512_v10 }
0x1223   :  { %2560 = vtanh.f32 %v1601_v23 }
0x122d   :  { %v2561_v24 = vpop.eup %2560 }
0x122e   :  { %1605 = vrot.lane.b32.xlu1 %v2561_v24, %s2674_s3 }
0x1232   :  { %1484 = vrot.lane.b32.xlu1 %v1470_v4, %s2675_s29 }
0x1245   :  { %v1500_v25 = vpop.permute.xlu0 %1499 }
0x1246   :  { %v1502_v26 = vadd.f32 %v1500_v25, %v1468_v3 }
0x1248   :  { %2562 = vtanh.f32 %v1502_v26 }
0x1252   :  { %v2563_v27 = vpop.eup %2562 }
0x1253   :  { %1506 = vrot.lane.b32.xlu1 %v2563_v27, %s2674_s3 }
0x12a0   :  { %v1606_v30 = vpop.permute.xlu1 %1605 }
0x12a1   :  { %v1608_v32 = vmul.f32 %v1606_v30, %v1603_v29 }
0x12a3   :  { %v3070_v33 = vadd.f32 %v1609_v31, %v1608_v32 }
0x12a4   :  { %v1485_v37 = vpop.permute.xlu1 %1484 }
0x12a5   :  { %1612 = vrot.lane.b32.xlu0 %v3070_v33, %s2674_s3  ;;  %v1487_v40 = vadd.f32 %v1485_v37, %v1468_v3 }
0x12a7   :  { %v2107_v41 = vmul.f32 -1.442695, %v1487_v40 }
0x12a9   :  { %2564 = vpow2.f32 %v2107_v41 }
0x12b3   :  { %v2565_v43 = vpop.eup %2564 }
0x12b4   :  { %v1491_v48 = vadd.f32 1.0, %v2565_v43 }
0x12b6   :  { %2566 = vrcp.f32 %v1491_v48 }
0x12c0   :  { %v2567_v49 = vpop.eup %2566 }
0x12c1   :  { %v1504_v42 = vsub.f32 1.0, %v2567_v49  ;;  %v1510_v50 = vmul.f32 %v2567_v49, %v3042_v59 }
0x12c5   :  { %v1507_v35 = vpop.permute.xlu1 %1506 }
0x12c6   :  { %v1509_v36 = vmul.f32 %v1507_v35, %v1504_v42 }
0x12c8   :  { %v3075_v47 = vadd.f32 %v1510_v50, %v1509_v36 }
0x1317   :  { %v1613_v53 = vpop.permute.xlu0 %1612 }
0x1318   :  { %v1615_v54 = vsel %vm184_vm3, %v1613_v53, %v3075_v47  ;;  %2259 = vmatmul.mubr.msk.f32.vlgmr.msra.gmra.mrb[14].mxu1 %vm184_vm3, %v1613_v53 }
0x1319   :  { %2110 = vmatmul.mubr.msk.f32.vlgmr.msra.gmra.mrb[14].mxu0 %vm307_vm5, %v1615_v54  ;;  %2435 = vmatpush1.bf16.msra.mxu1 %v2809_v38  ;;  %v2594_v38 = vld [vmem:[%s3167_s5] ss:$0 sm:$0xff] }
0x131a   :  { %2437 = vmatprep.subr.bf16.mxu1 %v2811_v39  ;;  %1901 = vmatprep.mubr.f32.mxu1 %v2672_v1  ;;  %v1956_v54 = vld [vmem:[%s3170_s8] sm:$0xff] }
0x131b   :  { %2269 = vmatprep.mubr.msk.f32.mxu0 %vm2671_vm0, %v2672_v1 }
0x131d   :  { %2439 = vmatpush1.bf16.msra.mxu1 %v2816_v45 }
0x131e   :  { %2441 = vmatprep.subr.bf16.mxu1 %v2820_v46  ;;  %v1730_v46 = vld [vmem:[#allocation2 + $0xe] sm:$0x3] }
0x1321   :  { %2443 = vmatpush1.bf16.msra.mxu1 %v2823_v51 }
0x1322   :  { %2445 = vmatprep.subr.bf16.mxu1 %v2828_v52 }
0x1325   :  { %2447 = vmatpush1.bf16.msra.mxu1 %v2834_v56 }
0x13eb   :  { %v1799_v44 = vpop.f32.mrb[14].mxu1 }
0x13ec   :  { %v1800_v39 = vadd.f32 %v2594_v38, %v1799_v44  ;;  %v1685_v55 = vpop.f32.mrb[14].mxu0  ;;  %v2260_v57 = vpop.f32.mrb[15].mxu1  ;;  %v1957_v44 = vld [vmem:[%s3170_s8 + $0x8] sm:$0xff]  ;;  %v1958_v38 = vld [vmem:[%s3170_s8 + $0x10] sm:$0xff] }
0x13ed   :  { %v1686_v1 = vadd.f32 %v1685_v55, %v2870_v28  ;;  %v1687_v58 = vpop.f32.mrb[15].mxu0  ;;  %v1959_v55 = vld [vmem:[%s3170_s8 + $0x18] sm:$0xff]  ;;  %s2676_s8 = smov [#allocation7]  }
0x13ee   :  { %1811 = vrot.lane.b32.xlu0 %v1800_v39, %s2673_s28  ;;  %v1688_v45 = vadd.f32 %v1687_v58, %v2865_v9  ;;  %v1803_v51 = vadd.f32 %v1800_v39, %v1730_v46  ;;  %v2449_v39 = vpack.c.bf16 %v1957_v44, %v1956_v54  ;;  %v2452_v57 = vpack.c.bf16 %v1959_v55, %v1958_v38  ;;  %s2056_s21 = sshll.u32 %s2676_s8, 4  ;;  %s2057_s21 = int_to_ptr.vmem [resolvable:$true] %s2056_s21 }
0x13ef   :  { %1691 = vrot.lane.b32.xlu1 %v1686_v1, %s2675_s29  ;;  %s2617_s2 = scalar_lea.vmem %s2057_s21, 64  ;;  %p2622_p9 = scmp.lt.s32.totalorder %s2057_s21, %s2057_s21 }
0x13f0   :  { %v2114_v52 = vmul.f32 -1.442695, %v1803_v51  ;;  %2450 = vmatpush3.bf16.msra.mxu0 %v2449_v39  ;;  %p2618_p8 = scmp.ne.s32.totalorder %s2057_s21, %s2617_s2  ;;  %p2623_p10 = scmp.lt.s32.totalorder %s2617_s2, %s2617_s2 }
0x13f1   :  { %2451 = vmatprep.subr.bf16.mxu0 %v2670_v0 }
0x13f2   :  { %1712 = vrot.lane.b32.xlu0 %v1688_v45, %s2674_s3  ;;  %2568 = vpow2.f32 %v2114_v52  ;;  %p2624_p11 = por %p2623_p10, %p2622_p9 }
0x13f4   :  { %2453 = vmatpush3.bf16.msra.mxu0 %v2452_v57  ;;  %p2625_p12 = pnand %p2624_p11, %p2618_p8 }
0x13fc   :  { %v2569_v56 = vpop.eup %2568 }
0x13fd   :  { %v1807_v59 = vadd.f32 1.0, %v2569_v56 }
0x13ff   :  { %2570 = vrcp.f32 %v1807_v59 }
0x1409   :  { %v2571_v60 = vpop.eup %2570 }
0x140a   :  { %v1821_v14 = vsub.f32 1.0, %v2571_v60  ;;  %v1827_v16 = vmul.f32 %v2571_v60, %v3070_v33 }
0x1460   :  { %v1812_v61 = vpop.permute.xlu0 %1811 }
0x1461   :  { %v1814_v62 = vmul.f32 %v2571_v60, %v1812_v61  ;;  %v1692_v2 = vpop.permute.xlu1 %1691 }
0x1462   :  { %v1694_v8 = vadd.f32 %v1692_v2, %v1686_v1 }
0x1463   :  { %1816 = vrot.lane.b32.xlu1 %v1814_v62, %s2673_s28 }
0x1464   :  { %v2111_v3 = vmul.f32 -1.442695, %v1694_v8  ;;  %v1713_v6 = vpop.permute.xlu0 %1712 }
0x1466   :  { %2572 = vpow2.f32 %v2111_v3 }
0x1470   :  { %v2573_v5 = vpop.eup %2572 }
0x1471   :  { %v1698_v4 = vadd.f32 1.0, %v2573_v5 }
0x1473   :  { %2574 = vrcp.f32 %v1698_v4 }
0x147d   :  { %v2575_v10 = vpop.eup %2574 }
0x147e   :  { %v1715_v7 = vmul.f32 %v2575_v10, %v1713_v6 }
0x1480   :  { %1717 = vrot.lane.b32.xlu0 %v1715_v7, %s2673_s28 }
0x1484   :  { %1702 = vrot.lane.b32.xlu0 %v1688_v45, %s2675_s29 }
0x14d5   :  { %v1817_v34 = vpop.permute.xlu1 %1816 }
0x14d6   :  { %v1819_v11 = vadd.f32 %v1817_v34, %v1730_v46 }
0x14d8   :  { %2576 = vtanh.f32 %v1819_v11 }
0x14e2   :  { %v2577_v17 = vpop.eup %2576 }
0x14e3   :  { %1823 = vrot.lane.b32.xlu1 %v2577_v17, %s2674_s3 }
0x14f2   :  { %v1718_v12 = vpop.permute.xlu0 %1717 }
0x14f3   :  { %v1720_v13 = vadd.f32 %v1718_v12, %v1686_v1 }
0x14f5   :  { %2578 = vtanh.f32 %v1720_v13 }
0x14f6   :  { %v1703_v20 = vpop.permute.xlu0 %1702 }
0x14f7   :  { %v1705_v21 = vadd.f32 %v1703_v20, %v1686_v1 }
0x14f9   :  { %v2112_v22 = vmul.f32 -1.442695, %v1705_v21 }
0x14fb   :  { %2580 = vpow2.f32 %v2112_v22 }
0x14ff   :  { %v2579_v63 = vpop.eup %2578 }
0x1500   :  { %1724 = vrot.lane.b32.xlu1 %v2579_v63, %s2674_s3 }
0x1505   :  { %v2581_v23 = vpop.eup %2580 }
0x1506   :  { %v1709_v24 = vadd.f32 1.0, %v2581_v23 }
0x1508   :  { %2582 = vrcp.f32 %v1709_v24 }
0x1512   :  { %v2583_v25 = vpop.eup %2582 }
0x1513   :  { %v1722_v27 = vsub.f32 1.0, %v2583_v25  ;;  %v1728_v30 = vmul.f32 %v2583_v25, %v3075_v47 }
0x1555   :  { %v1824_v15 = vpop.permute.xlu1 %1823 }
0x1556   :  { %v1826_v18 = vmul.f32 %v1824_v15, %v1821_v14 }
0x1558   :  { %v1828_v19 = vadd.f32 %v1827_v16, %v1826_v18 }
0x155a   :  { %1830 = vrot.lane.b32.xlu0 %v1828_v19, %s2674_s3 }
0x1572   :  { %v1725_v26 = vpop.permute.xlu1 %1724 }
0x1573   :  { %v1727_v29 = vmul.f32 %v1725_v26, %v1722_v27 }
0x1575   :  { %v1729_v31 = vadd.f32 %v1728_v30, %v1727_v29 }
0x15cc   :  { %v1831_v32 = vpop.permute.xlu0 %1830 }
0x15cd   :  { %v1833_v33 = vsel %vm184_vm3, %v1831_v32, %v1729_v31  ;;  %1949 = vst.msk [vmem:[#allocation7] sm:$0x3] %vm1948_vm6, %v1831_v32 }
0x15ce   :  { %2115 = vmatmul.mubr.msk.f32.vlgmr.msra.gmra.mrb[16].mxu1 %vm307_vm5, %v1833_v33 }
0x16a1   :  { %v1903_v37 = vpop.f32.mrb[16].mxu1 }
0x16a2   :  { %v1904_v40 = vadd.f32 %v1903_v37, %v2870_v28  ;;  %v1905_v41 = vpop.f32.mrb[17].mxu1 }
0x16a3   :  { %v1906_v43 = vadd.f32 %v1905_v41, %v2865_v9 }
0x16a4   :  { %1909 = vrot.lane.b32.xlu1 %v1904_v40, %s2675_s29 }
0x16a5   :  { %1930 = vrot.lane.b32.xlu0 %v1906_v43, %s2674_s3 }
0x16a9   :  { %1920 = vrot.lane.b32.xlu0 %v1906_v43, %s2675_s29 }
0x1716   :  { %v1910_v48 = vpop.permute.xlu1 %1909 }
0x1717   :  { %v1912_v49 = vadd.f32 %v1910_v48, %v1904_v40  ;;  %v1931_v47 = vpop.permute.xlu0 %1930 }
0x1719   :  { %v2116_v35 = vmul.f32 -1.442695, %v1912_v49 }
0x171b   :  { %2584 = vpow2.f32 %v2116_v35  ;;  %v1921_v58 = vpop.permute.xlu0 %1920 }
0x171c   :  { %v1923_v45 = vadd.f32 %v1921_v58, %v1904_v40 }
0x171e   :  { %v2117_v46 = vmul.f32 -1.442695, %v1923_v45 }
0x1725   :  { %v2585_v42 = vpop.eup %2584 }
0x1726   :  { %v1916_v36 = vadd.f32 1.0, %v2585_v42 }
0x1728   :  { %2586 = vrcp.f32 %v1916_v36 }
0x1732   :  { %v2587_v50 = vpop.eup %2586 }
0x1733   :  { %v1933_v53 = vmul.f32 %v2587_v50, %v1931_v47 }
0x1735   :  { %1935 = vrot.lane.b32.xlu1 %v1933_v53, %s2673_s28 }
0x17a7   :  { %v1936_v28 = vpop.permute.xlu1 %1935 }
0x17a8   :  { %v1938_v9 = vadd.f32 %v1936_v28, %v1904_v40 }
0x17aa   :  { %2588 = vtanh.f32 %v1938_v9 }
0x17ab   :  { %2590 = vpow2.f32 %v2117_v46 }
0x17b4   :  { %v2589_v1 = vpop.eup %2588 }
0x17b5   :  { %1942 = vrot.lane.b32.xlu1 %v2589_v1, %s2674_s3  ;;  %v2591_v51 = vpop.eup %2590 }
0x17b6   :  { %v1927_v52 = vadd.f32 1.0, %v2591_v51 }
0x17b8   :  { %2592 = vrcp.f32 %v1927_v52 }
0x17c2   :  { %v2593_v56 = vpop.eup %2592 }
0x17c3   :  { %v1940_v59 = vsub.f32 1.0, %v2593_v56  ;;  %v1946_v62 = vmul.f32 %v2593_v56, %v1729_v31 }
0x1827   :  { %v1943_v60 = vpop.permute.xlu1 %1942 }
0x1828   :  { %v1945_v61 = vmul.f32 %v1943_v60, %v1940_v59 }
0x182a   :  { %v1947_v2 = vadd.f32 %v1946_v62, %v1945_v61 }
0x182c   :  { %1951 = vrot.lane.b32.xlu0 %v1947_v2, %s2674_s3 }
0x189e   :  { %v1952_v0 = vpop.permute.xlu0 %1951 }
0x189f   :  { %1955 = vst.msk [vmem:[#allocation7 + $0x2] sm:$0x3] %vm1948_vm6, %v1952_v0  ;;  %2270 = vmatmul.mubr.msk.f32.vlgmr.msra.gmra.mrb[16].mxu0 %vm184_vm3, %v1952_v0 }
0x18a0   :  { %2628 = shalt.err (!%p2625_p12)
}
0x18a1   :  { %s2629_s0 = scalar_lea.hbm %s3173_s11, 64 }
0x18a2   :  { %p2630_p13 = scmp.ne.s32.totalorder %s3173_s11, %s2629_s0  ;;  %p2633_p0 = scmp.lt.u32.totalorder %s2629_s0, %s3173_s11 }
0x18a4   :  { %p2635_p1 = pnand %p2633_p0, %p2630_p13 }
0x18a6   :  { %2638 = shalt.err (!%p2635_p1)
}
0x18a7   :  { %s2677_s27 = smov 2   ;;  %v2118_v8 = vld [vmem:[%s3171_s9] ss:$0 sm:$0xff]  ;;  %s2678_s1 = smov [#allocation6]   ;;  %vm2039_vm7 = vcmask 17408  }
0x18a8   :  { %2062 = dma.vmem_to_hbm [thread:$0]  %s2057_s21, 64, %s3173_s11, [#allocation8], %s2675_s29, %s2675_s29, %s2677_s27  }
0x18a9   :  { %s2047_s13 = sshll.u32 %s2678_s1, 4  ;;  %s2048_s13 = int_to_ptr.vmem [resolvable:$true] %s2047_s13 }
0x18aa   :  { %s2639_s7 = scalar_lea.vmem %s2048_s13, 32  ;;  %p2644_p3 = scmp.lt.s32.totalorder %s2048_s13, %s2048_s13 }
0x18ab   :  { %p2640_p2 = scmp.ne.s32.totalorder %s2048_s13, %s2639_s7  ;;  %p2645_p4 = scmp.lt.s32.totalorder %s2639_s7, %s2639_s7 }
0x18ad   :  { %p2646_p5 = por %p2645_p4, %p2644_p3 }
0x18af   :  { %p2647_p6 = pnand %p2646_p5, %p2640_p2 }
0x1972   :  { %v2035_v3 = vpop.f32.mrb[16].mxu0 }
0x1973   :  { %v2036_v5 = vadd.f32 %v2118_v8, %v2035_v3  ;;  %v2271_v4 = vpop.f32.mrb[17].mxu0 }
0x1975   :  { %2040 = vst.msk [vmem:[#allocation6] sm:$0x3] %vm2039_vm7, %v2036_v5 }
0x1976   :  { %2650 = shalt.err (!%p2647_p6)
}
0x1977   :  { %s2651_s14 = scalar_lea.hbm %s3172_s10, 32 }
0x1978   :  { %p2652_p7 = scmp.ne.s32.totalorder %s3172_s10, %s2651_s14  ;;  %p2655_p8 = scmp.lt.u32.totalorder %s2651_s14, %s3172_s10 }
0x197a   :  { %p2657_p9 = pnand %p2655_p8, %p2652_p7 }
0x197c   :  { %2660 = shalt.err (!%p2657_p9)
}
0x197d   :  { %2050 = dma.vmem_to_hbm [thread:$0]  %s2048_s13, 32, %s3172_s10, [#allocation5]  }
0x197e   :  { %2663 = dma.done.wait [#allocation5], 32  }
0x197f   :  { %2664 = vsyncadd [#allocation5], 4294967264 }
0x1980   :  { %2665 = dma.done.wait [#allocation8], 64  }
0x1981   :  { %2666 = vsyncadd [#allocation8], 4294967232 }
0x1982   :  { %2069 = vsyncpa [#allocation4], 1 }
0x1983   :  { %2070 = vsyncpa [#allocation5], 1 }
0x1984   :  { %2071 = vsyncpa [#allocation8], 1 }

</bundles_post_ra>
